<compile_context>
chip_gen: v5e
topology: v5e:2x2
jax: 0.10.0
libtpu: 0.0.40
codegen_flags: <defaults>
</compile_context>

<pallas_src>
from math import sqrt

import jax
import jax.numpy as jnp
from jax.experimental import pallas as pl

# ----------------------------- config ---------------------------------------
B, L, D = 2, 8, 32          # batch, seq len, d_model
H, DH = 4, 8                # heads, head dim (H*DH == D)
D_FF = 64                   # FFN hidden
NUM_LAYERS = 2
EPS = 1e-5                  # nn.LayerNorm default
SCALE = 1.0 / sqrt(DH)


# ----------------------------- kernel helpers --------------------------------
def _layernorm_f32(z, g, b):
    mean = jnp.mean(z, axis=-1, keepdims=True)
    var = jnp.mean((z - mean) ** 2, axis=-1, keepdims=True)
    return (z - mean) * jax.lax.rsqrt(var + EPS) * g + b


# ----------------------------- fused whole-encoder kernel --------------------
def _encoder_kernel(
    x_ref,
    wqkv_ref, bqkv_ref, wo_ref, bo_ref,
    ln1g_ref, ln1b_ref, w1_ref, b1_ref, w2_ref, b2_ref,
    ln2g_ref, ln2b_ref,
    fing_ref, finb_ref,
    out_ref, attn_ref,
):
    x = x_ref[...].astype(jnp.float32)                                   # [B*L, D]
    attn_slabs = []

    for layer in range(NUM_LAYERS):                                      # static unroll
        # ---- fused QKV projection: one [B*L, D] x [D, 3D] MXU matmul ----------
        qkv = (jnp.dot(x, wqkv_ref[layer], preferred_element_type=jnp.float32)
               + bqkv_ref[layer])                                        # [B*L, 3D]

        # ---- head-major relayout with safe primitives only --------------------
        # (static lane slices + leading-dim reshape + leading-dim concat)
        q = jnp.concatenate(
            [qkv[:, h * DH:(h + 1) * DH].reshape(B, L, DH) for h in range(H)],
            axis=0)                                                      # [H*B, L, DH]
        k = jnp.concatenate(
            [qkv[:, D + h * DH:D + (h + 1) * DH].reshape(B, L, DH) for h in range(H)],
            axis=0)
        v = jnp.concatenate(
            [qkv[:, 2 * D + h * DH:2 * D + (h + 1) * DH].reshape(B, L, DH)
             for h in range(H)],
            axis=0)

        # ---- all heads & batches in ONE batched matmul + ONE softmax ----------
        s = jnp.einsum("gqd,gkd->gqk", q, k,
                       preferred_element_type=jnp.float32) * SCALE        # [H*B, L, L]
        m = jnp.max(s, axis=-1, keepdims=True)
        p = jnp.exp(s - m)
        denom = jnp.sum(p, axis=-1, keepdims=True)
        p = p * pl.reciprocal(denom, approx=False)                        # EUP slot

        # lane-dense attention slab for this layer: [L, H*B*L] (lanes = 64)
        attn_slabs.append(jnp.concatenate([p[g] for g in range(H * B)], axis=-1))

        # ---- context, merged heads assembled in registers (no VMEM scratch) ---
        ctx = jnp.einsum("gqk,gkd->gqd", p, v,
                         preferred_element_type=jnp.float32)              # [H*B, L, DH]
        ctx2 = jnp.concatenate(
            [ctx[h * B:(h + 1) * B].reshape(B * L, DH) for h in range(H)],
            axis=-1)                                                      # [B*L, D]

        # ---- output projection + residual + LayerNorm 1 ------------------------
        o = (jnp.dot(ctx2, wo_ref[layer], preferred_element_type=jnp.float32)
             + bo_ref[layer])
        z1 = _layernorm_f32(x + o, ln1g_ref[layer], ln1b_ref[layer])

        # ---- pointwise FFN (Conv1d k=1 == Linear) + residual + LayerNorm 2 -----
        h1 = jnp.maximum(
            jnp.dot(z1, w1_ref[layer], preferred_element_type=jnp.float32)
            + b1_ref[layer], 0.0)
        f = (jnp.dot(h1, w2_ref[layer], preferred_element_type=jnp.float32)
             + b2_ref[layer])
        x = _layernorm_f32(z1 + f, ln2g_ref[layer], ln2b_ref[layer])

    # ---- final norm_layer (LayerNorm) ------------------------------------------
    out_ref[...] = _layernorm_f32(x, fing_ref[...], finb_ref[...]).astype(out_ref.dtype)

    # ---- single lane-dense attention write: [L, NUM_LAYERS*H*B*L] = [8, 128] ----
    attn_ref[...] = jnp.concatenate(attn_slabs, axis=-1).astype(attn_ref.dtype)


# ----------------------------- wrapper glue -----------------------------------
@jax.jit
def encoder_forward(x, packed):
    # One fused pallas_call for the whole encoder (all layers + final LN).
    m = B * L
    out2, attn = pl.pallas_call(
        _encoder_kernel,
        out_shape=(
            jax.ShapeDtypeStruct((m, D), x.dtype),
            jax.ShapeDtypeStruct((L, NUM_LAYERS * H * B * L), jnp.float32),
        ),
    )(
        x.reshape(m, D),
        packed["w_qkv"], packed["b_qkv"], packed["wo"], packed["bo"],
        packed["ln1_g"], packed["ln1_b"], packed["w1"], packed["b1"],
        packed["w2"], packed["b2"], packed["ln2_g"], packed["ln2_b"],
        packed["fin_g"], packed["fin_b"],
    )
    # Column index layout: layer*(H*B*L) + h*(B*L) + b*L + j, rows = query pos i.
    attns = attn.reshape(L, NUM_LAYERS, H, B, L).transpose(1, 3, 2, 0, 4)  # [NL,B,H,L,L]
    return out2.reshape(B, L, D), attns


def pack_params(layer_params, final_gamma, final_beta):
    # Done ONCE at init time (hoisted out of the per-forward path).
    def stack(fn):
        return jnp.stack([fn(p) for p in layer_params], axis=0)

    return dict(
        w_qkv=stack(lambda p: jnp.concatenate([p["wq"], p["wk"], p["wv"]], axis=1)),
        b_qkv=stack(lambda p: jnp.concatenate(
            [p["bq"], p["bk"], p["bv"]]).reshape(1, 3 * D)),
        wo=stack(lambda p: p["wo"]),
        bo=stack(lambda p: p["bo"].reshape(1, D)),
        ln1_g=stack(lambda p: p["ln1_g"].reshape(1, D)),
        ln1_b=stack(lambda p: p["ln1_b"].reshape(1, D)),
        w1=stack(lambda p: p["w1"]),
        b1=stack(lambda p: p["bf1"].reshape(1, D_FF)),
        w2=stack(lambda p: p["w2"]),
        b2=stack(lambda p: p["bf2"].reshape(1, D)),
        ln2_g=stack(lambda p: p["ln2_g"].reshape(1, D)),
        ln2_b=stack(lambda p: p["ln2_b"].reshape(1, D)),
        fin_g=final_gamma.reshape(1, D),
        fin_b=final_beta.reshape(1, D),
    )


# ----------------------------- params & reference -----------------------------
def init_params(key):
    layers = []
    for i in range(NUM_LAYERS):
        ks = jax.random.split(jax.random.fold_in(key, i), 6)
        s = 1.0 / sqrt(D)
        sf = 1.0 / sqrt(D_FF)
        layers.append(dict(
            wq=jax.random.uniform(ks[0], (D, D), jnp.float32, -s, s),
            bq=jnp.zeros((D,), jnp.float32),
            wk=jax.random.uniform(ks[1], (D, D), jnp.float32, -s, s),
            bk=jnp.zeros((D,), jnp.float32),
            wv=jax.random.uniform(ks[2], (D, D), jnp.float32, -s, s),
            bv=jnp.zeros((D,), jnp.float32),
            wo=jax.random.uniform(ks[3], (D, D), jnp.float32, -s, s),
            bo=jnp.zeros((D,), jnp.float32),
            w1=jax.random.uniform(ks[4], (D, D_FF), jnp.float32, -s, s),
            bf1=jnp.zeros((D_FF,), jnp.float32),
            w2=jax.random.uniform(ks[5], (D_FF, D), jnp.float32, -sf, sf),
            bf2=jnp.zeros((D,), jnp.float32),
            ln1_g=jnp.ones((D,), jnp.float32), ln1_b=jnp.zeros((D,), jnp.float32),
            ln2_g=jnp.ones((D,), jnp.float32), ln2_b=jnp.zeros((D,), jnp.float32),
        ))
    final_gamma = jnp.ones((D,), jnp.float32)
    final_beta = jnp.zeros((D,), jnp.float32)
    return layers, final_gamma, final_beta


def _ref_layernorm(x, g, b):
    m = jnp.mean(x, axis=-1, keepdims=True)
    v = jnp.mean((x - m) ** 2, axis=-1, keepdims=True)
    return (x - m) * jax.lax.rsqrt(v + EPS) * g + b


def ref_encoder(x, layer_params, final_gamma, final_beta):
    attns = []
    for p in layer_params:
        b, l, d = x.shape
        q = (x @ p["wq"] + p["bq"]).reshape(b, l, H, DH).transpose(0, 2, 1, 3)
        k = (x @ p["wk"] + p["bk"]).reshape(b, l, H, DH).transpose(0, 2, 1, 3)
        v = (x @ p["wv"] + p["bv"]).reshape(b, l, H, DH).transpose(0, 2, 1, 3)
        s = jnp.einsum("bhld,bhsd->bhls", q, k) / sqrt(DH)
        a = jax.nn.softmax(s, axis=-1)
        o = jnp.einsum("bhls,bhsd->bhld", a, v).transpose(0, 2, 1, 3).reshape(b, l, d)
        o = o @ p["wo"] + p["bo"]
        x1 = _ref_layernorm(x + o, p["ln1_g"], p["ln1_b"])
        f = jnp.maximum(x1 @ p["w1"] + p["bf1"], 0.0) @ p["w2"] + p["bf2"]
        x = _ref_layernorm(x1 + f, p["ln2_g"], p["ln2_b"])
        attns.append(a)
    x = _ref_layernorm(x, final_gamma, final_beta)
    return x, attns


# ----------------------------- main -------------------------------------------
if __name__ == "__main__":
    key = jax.random.PRNGKey(0)
    kx, kp = jax.random.split(key)
    x = jax.random.normal(kx, (B, L, D), jnp.float32)
    layer_params, fg, fb = init_params(kp)
    packed = pack_params(layer_params, fg, fb)      # one-time packing

    out, attns = encoder_forward(x, packed)
    out = jax.block_until_ready(out)
    attns = jax.block_until_ready(attns)

    ref_out, ref_attns = ref_encoder(x, layer_params, fg, fb)
    assert out.shape == (B, L, D)
    assert attns.shape == (NUM_LAYERS, B, H, L, L)
    assert jnp.allclose(out, ref_out, rtol=1e-4, atol=1e-4)
    for i in range(NUM_LAYERS):
        assert jnp.allclose(attns[i], ref_attns[i], rtol=1e-4, atol=1e-4)

    print("KERNEL_OK")
</pallas_src>

<mosaic_0001>
module attributes {stable_mosaic.version = 11 : i64} {
  func.func @_encoder_kernel(%arg0: memref<16x32xf32, #tpu.memory_space<vmem>>, %arg1: memref<2x32x96xf32, #tpu.memory_space<vmem>>, %arg2: memref<2x1x96xf32, #tpu.memory_space<vmem>>, %arg3: memref<2x32x32xf32, #tpu.memory_space<vmem>>, %arg4: memref<2x1x32xf32, #tpu.memory_space<vmem>>, %arg5: memref<2x1x32xf32, #tpu.memory_space<vmem>>, %arg6: memref<2x1x32xf32, #tpu.memory_space<vmem>>, %arg7: memref<2x32x64xf32, #tpu.memory_space<vmem>>, %arg8: memref<2x1x64xf32, #tpu.memory_space<vmem>>, %arg9: memref<2x64x32xf32, #tpu.memory_space<vmem>>, %arg10: memref<2x1x32xf32, #tpu.memory_space<vmem>>, %arg11: memref<2x1x32xf32, #tpu.memory_space<vmem>>, %arg12: memref<2x1x32xf32, #tpu.memory_space<vmem>>, %arg13: memref<1x32xf32, #tpu.memory_space<vmem>>, %arg14: memref<1x32xf32, #tpu.memory_space<vmem>>, %arg15: memref<16x32xf32, #tpu.memory_space<vmem>>, %arg16: memref<8x128xf32, #tpu.memory_space<vmem>>) attributes {dimension_semantics = [], scalar_prefetch = 0 : i64, scratch_operands = 0 : i64, tpu.core_type = #tpu.core_type<tc>} {
    %c0 = arith.constant 0 : index
    %c0_0 = arith.constant 0 : index
    %0 = vector.load %arg0[%c0, %c0_0] : memref<16x32xf32, #tpu.memory_space<vmem>>, vector<16x32xf32>
    %c0_1 = arith.constant 0 : index
    %c0_2 = arith.constant 0 : index
    %c0_3 = arith.constant 0 : index
    %1 = vector.load %arg1[%c0_1, %c0_2, %c0_3] : memref<2x32x96xf32, #tpu.memory_space<vmem>>, vector<1x32x96xf32>
    %2 = vector.shape_cast %1 : vector<1x32x96xf32> to vector<32x96xf32>
    %cst = arith.constant dense<0.000000e+00> : vector<16x96xf32>
    %3 = tpu.matmul %0, %2, %cst {dimension_numbers = #tpu.dot_dimension_numbers<[1], [0], [0], [1], [0, 0, 1, 1], [], []>} : vector<16x32xf32>, vector<32x96xf32>, vector<16x96xf32> -> vector<16x96xf32>
    %c0_4 = arith.constant 0 : index
    %c0_5 = arith.constant 0 : index
    %c0_6 = arith.constant 0 : index
    %4 = vector.load %arg2[%c0_4, %c0_5, %c0_6] : memref<2x1x96xf32, #tpu.memory_space<vmem>>, vector<1x1x96xf32>
    %5 = vector.shape_cast %4 : vector<1x1x96xf32> to vector<1x96xf32>
    %6 = vector.broadcast %5 : vector<1x96xf32> to vector<16x96xf32>
    %7 = arith.addf %3, %6 : vector<16x96xf32>
    %8 = vector.extract_strided_slice %7 {offsets = [0, 0], sizes = [16, 8], strides = [1, 1]} : vector<16x96xf32> to vector<16x8xf32>
    %9 = vector.shape_cast %8 : vector<16x8xf32> to vector<2x8x8xf32>
    %10 = vector.extract_strided_slice %7 {offsets = [0, 8], sizes = [16, 8], strides = [1, 1]} : vector<16x96xf32> to vector<16x8xf32>
    %11 = vector.shape_cast %10 : vector<16x8xf32> to vector<2x8x8xf32>
    %12 = vector.extract_strided_slice %7 {offsets = [0, 16], sizes = [16, 8], strides = [1, 1]} : vector<16x96xf32> to vector<16x8xf32>
    %13 = vector.shape_cast %12 : vector<16x8xf32> to vector<2x8x8xf32>
    %14 = vector.extract_strided_slice %7 {offsets = [0, 24], sizes = [16, 8], strides = [1, 1]} : vector<16x96xf32> to vector<16x8xf32>
    %15 = vector.shape_cast %14 : vector<16x8xf32> to vector<2x8x8xf32>
    %16 = tpu.concatenate %9, %11, %13, %15 in 0 : vector<2x8x8xf32>, vector<2x8x8xf32>, vector<2x8x8xf32>, vector<2x8x8xf32> -> vector<8x8x8xf32>
    %17 = vector.extract_strided_slice %7 {offsets = [0, 32], sizes = [16, 8], strides = [1, 1]} : vector<16x96xf32> to vector<16x8xf32>
    %18 = vector.shape_cast %17 : vector<16x8xf32> to vector<2x8x8xf32>
    %19 = vector.extract_strided_slice %7 {offsets = [0, 40], sizes = [16, 8], strides = [1, 1]} : vector<16x96xf32> to vector<16x8xf32>
    %20 = vector.shape_cast %19 : vector<16x8xf32> to vector<2x8x8xf32>
    %21 = vector.extract_strided_slice %7 {offsets = [0, 48], sizes = [16, 8], strides = [1, 1]} : vector<16x96xf32> to vector<16x8xf32>
    %22 = vector.shape_cast %21 : vector<16x8xf32> to vector<2x8x8xf32>
    %23 = vector.extract_strided_slice %7 {offsets = [0, 56], sizes = [16, 8], strides = [1, 1]} : vector<16x96xf32> to vector<16x8xf32>
    %24 = vector.shape_cast %23 : vector<16x8xf32> to vector<2x8x8xf32>
    %25 = tpu.concatenate %18, %20, %22, %24 in 0 : vector<2x8x8xf32>, vector<2x8x8xf32>, vector<2x8x8xf32>, vector<2x8x8xf32> -> vector<8x8x8xf32>
    %26 = vector.extract_strided_slice %7 {offsets = [0, 64], sizes = [16, 8], strides = [1, 1]} : vector<16x96xf32> to vector<16x8xf32>
    %27 = vector.shape_cast %26 : vector<16x8xf32> to vector<2x8x8xf32>
    %28 = vector.extract_strided_slice %7 {offsets = [0, 72], sizes = [16, 8], strides = [1, 1]} : vector<16x96xf32> to vector<16x8xf32>
    %29 = vector.shape_cast %28 : vector<16x8xf32> to vector<2x8x8xf32>
    %30 = vector.extract_strided_slice %7 {offsets = [0, 80], sizes = [16, 8], strides = [1, 1]} : vector<16x96xf32> to vector<16x8xf32>
    %31 = vector.shape_cast %30 : vector<16x8xf32> to vector<2x8x8xf32>
    %32 = vector.extract_strided_slice %7 {offsets = [0, 88], sizes = [16, 8], strides = [1, 1]} : vector<16x96xf32> to vector<16x8xf32>
    %33 = vector.shape_cast %32 : vector<16x8xf32> to vector<2x8x8xf32>
    %34 = tpu.concatenate %27, %29, %31, %33 in 0 : vector<2x8x8xf32>, vector<2x8x8xf32>, vector<2x8x8xf32>, vector<2x8x8xf32> -> vector<8x8x8xf32>
    "tpu.trace_start"() <{level = 10 : i32, message = "gqd,gkd->gqk"}> : () -> ()
    %cst_7 = arith.constant dense<0.000000e+00> : vector<8x8x8xf32>
    %35 = tpu.matmul %16, %25, %cst_7 {dimension_numbers = #tpu.dot_dimension_numbers<[2], [2], [1], [1], [0, 0, 0, 1, 1, 1], [0], [0]>} : vector<8x8x8xf32>, vector<8x8x8xf32>, vector<8x8x8xf32> -> vector<8x8x8xf32>
    "tpu.trace_stop"() : () -> ()
    %cst_8 = arith.constant 0.353553385 : f32
    %36 = vector.broadcast %cst_8 : f32 to vector<8x8x8xf32>
    %37 = arith.mulf %35, %36 : vector<8x8x8xf32>
    %cst_9 = arith.constant dense<0xFF800000> : vector<8x8xf32>
    %38 = vector.multi_reduction <maximumf>, %37, %cst_9 [2] : vector<8x8x8xf32> to vector<8x8xf32>
    %39 = vector.shape_cast %38 : vector<8x8xf32> to vector<8x8x1xf32>
    %40 = vector.broadcast %39 : vector<8x8x1xf32> to vector<8x8x8xf32>
    %41 = arith.subf %37, %40 : vector<8x8x8xf32>
    %42 = math.exp %41 : vector<8x8x8xf32>
    %cst_10 = arith.constant dense<0.000000e+00> : vector<8x8xf32>
    %43 = vector.multi_reduction <add>, %42, %cst_10 [2] : vector<8x8x8xf32> to vector<8x8xf32>
    %44 = vector.shape_cast %43 : vector<8x8xf32> to vector<8x8x1xf32>
    %45 = tpu.reciprocal %44 : vector<8x8x1xf32> -> vector<8x8x1xf32>
    %46 = vector.broadcast %45 : vector<8x8x1xf32> to vector<8x8x8xf32>
    %47 = arith.mulf %42, %46 : vector<8x8x8xf32>
    %48 = vector.extract_strided_slice %47 {offsets = [0, 0, 0], sizes = [1, 8, 8], strides = [1, 1, 1]} : vector<8x8x8xf32> to vector<1x8x8xf32>
    %49 = vector.shape_cast %48 : vector<1x8x8xf32> to vector<8x8xf32>
    %50 = vector.extract_strided_slice %47 {offsets = [1, 0, 0], sizes = [1, 8, 8], strides = [1, 1, 1]} : vector<8x8x8xf32> to vector<1x8x8xf32>
    %51 = vector.shape_cast %50 : vector<1x8x8xf32> to vector<8x8xf32>
    %52 = vector.extract_strided_slice %47 {offsets = [2, 0, 0], sizes = [1, 8, 8], strides = [1, 1, 1]} : vector<8x8x8xf32> to vector<1x8x8xf32>
    %53 = vector.shape_cast %52 : vector<1x8x8xf32> to vector<8x8xf32>
    %54 = vector.extract_strided_slice %47 {offsets = [3, 0, 0], sizes = [1, 8, 8], strides = [1, 1, 1]} : vector<8x8x8xf32> to vector<1x8x8xf32>
    %55 = vector.shape_cast %54 : vector<1x8x8xf32> to vector<8x8xf32>
    %56 = vector.extract_strided_slice %47 {offsets = [4, 0, 0], sizes = [1, 8, 8], strides = [1, 1, 1]} : vector<8x8x8xf32> to vector<1x8x8xf32>
    %57 = vector.shape_cast %56 : vector<1x8x8xf32> to vector<8x8xf32>
    %58 = vector.extract_strided_slice %47 {offsets = [5, 0, 0], sizes = [1, 8, 8], strides = [1, 1, 1]} : vector<8x8x8xf32> to vector<1x8x8xf32>
    %59 = vector.shape_cast %58 : vector<1x8x8xf32> to vector<8x8xf32>
    %60 = vector.extract_strided_slice %47 {offsets = [6, 0, 0], sizes = [1, 8, 8], strides = [1, 1, 1]} : vector<8x8x8xf32> to vector<1x8x8xf32>
    %61 = vector.shape_cast %60 : vector<1x8x8xf32> to vector<8x8xf32>
    %62 = vector.extract_strided_slice %47 {offsets = [7, 0, 0], sizes = [1, 8, 8], strides = [1, 1, 1]} : vector<8x8x8xf32> to vector<1x8x8xf32>
    %63 = vector.shape_cast %62 : vector<1x8x8xf32> to vector<8x8xf32>
    %64 = tpu.concatenate %49, %51, %53, %55, %57, %59, %61, %63 in 1 : vector<8x8xf32>, vector<8x8xf32>, vector<8x8xf32>, vector<8x8xf32>, vector<8x8xf32>, vector<8x8xf32>, vector<8x8xf32>, vector<8x8xf32> -> vector<8x64xf32>
    "tpu.trace_start"() <{level = 10 : i32, message = "gqk,gkd->gqd"}> : () -> ()
    %cst_11 = arith.constant dense<0.000000e+00> : vector<8x8x8xf32>
    %65 = tpu.matmul %47, %34, %cst_11 {dimension_numbers = #tpu.dot_dimension_numbers<[2], [1], [1], [2], [0, 0, 0, 1, 1, 2], [0], [0]>} : vector<8x8x8xf32>, vector<8x8x8xf32>, vector<8x8x8xf32> -> vector<8x8x8xf32>
    "tpu.trace_stop"() : () -> ()
    %66 = vector.extract_strided_slice %65 {offsets = [0, 0, 0], sizes = [2, 8, 8], strides = [1, 1, 1]} : vector<8x8x8xf32> to vector<2x8x8xf32>
    %67 = vector.shape_cast %66 : vector<2x8x8xf32> to vector<16x8xf32>
    %68 = vector.extract_strided_slice %65 {offsets = [2, 0, 0], sizes = [2, 8, 8], strides = [1, 1, 1]} : vector<8x8x8xf32> to vector<2x8x8xf32>
    %69 = vector.shape_cast %68 : vector<2x8x8xf32> to vector<16x8xf32>
    %70 = vector.extract_strided_slice %65 {offsets = [4, 0, 0], sizes = [2, 8, 8], strides = [1, 1, 1]} : vector<8x8x8xf32> to vector<2x8x8xf32>
    %71 = vector.shape_cast %70 : vector<2x8x8xf32> to vector<16x8xf32>
    %72 = vector.extract_strided_slice %65 {offsets = [6, 0, 0], sizes = [2, 8, 8], strides = [1, 1, 1]} : vector<8x8x8xf32> to vector<2x8x8xf32>
    %73 = vector.shape_cast %72 : vector<2x8x8xf32> to vector<16x8xf32>
    %74 = tpu.concatenate %67, %69, %71, %73 in 1 : vector<16x8xf32>, vector<16x8xf32>, vector<16x8xf32>, vector<16x8xf32> -> vector<16x32xf32>
    %c0_12 = arith.constant 0 : index
    %c0_13 = arith.constant 0 : index
    %c0_14 = arith.constant 0 : index
    %75 = vector.load %arg3[%c0_12, %c0_13, %c0_14] : memref<2x32x32xf32, #tpu.memory_space<vmem>>, vector<1x32x32xf32>
    %76 = vector.shape_cast %75 : vector<1x32x32xf32> to vector<32x32xf32>
    %cst_15 = arith.constant dense<0.000000e+00> : vector<16x32xf32>
    %77 = tpu.matmul %74, %76, %cst_15 {dimension_numbers = #tpu.dot_dimension_numbers<[1], [0], [0], [1], [0, 0, 1, 1], [], []>} : vector<16x32xf32>, vector<32x32xf32>, vector<16x32xf32> -> vector<16x32xf32>
    %c0_16 = arith.constant 0 : index
    %c0_17 = arith.constant 0 : index
    %c0_18 = arith.constant 0 : index
    %78 = vector.load %arg4[%c0_16, %c0_17, %c0_18] : memref<2x1x32xf32, #tpu.memory_space<vmem>>, vector<1x1x32xf32>
    %79 = vector.shape_cast %78 : vector<1x1x32xf32> to vector<1x32xf32>
    %80 = vector.broadcast %79 : vector<1x32xf32> to vector<16x32xf32>
    %81 = arith.addf %77, %80 : vector<16x32xf32>
    %82 = arith.addf %0, %81 : vector<16x32xf32>
    %c0_19 = arith.constant 0 : index
    %c0_20 = arith.constant 0 : index
    %c0_21 = arith.constant 0 : index
    %83 = vector.load %arg5[%c0_19, %c0_20, %c0_21] : memref<2x1x32xf32, #tpu.memory_space<vmem>>, vector<1x1x32xf32>
    %84 = vector.shape_cast %83 : vector<1x1x32xf32> to vector<1x32xf32>
    %c0_22 = arith.constant 0 : index
    %c0_23 = arith.constant 0 : index
    %c0_24 = arith.constant 0 : index
    %85 = vector.load %arg6[%c0_22, %c0_23, %c0_24] : memref<2x1x32xf32, #tpu.memory_space<vmem>>, vector<1x1x32xf32>
    %86 = vector.shape_cast %85 : vector<1x1x32xf32> to vector<1x32xf32>
    %cst_25 = arith.constant dense<0.000000e+00> : vector<16xf32>
    %87 = vector.multi_reduction <add>, %82, %cst_25 [1] : vector<16x32xf32> to vector<16xf32>
    %88 = vector.shape_cast %87 : vector<16xf32> to vector<16x1xf32>
    %cst_26 = arith.constant 3.200000e+01 : f32
    %89 = vector.broadcast %cst_26 : f32 to vector<16x1xf32>
    %90 = arith.divf %88, %89 : vector<16x1xf32>
    %91 = vector.broadcast %90 : vector<16x1xf32> to vector<16x32xf32>
    %92 = arith.subf %82, %91 : vector<16x32xf32>
    %93 = arith.mulf %92, %92 : vector<16x32xf32>
    %cst_27 = arith.constant dense<0.000000e+00> : vector<16xf32>
    %94 = vector.multi_reduction <add>, %93, %cst_27 [1] : vector<16x32xf32> to vector<16xf32>
    %95 = vector.shape_cast %94 : vector<16xf32> to vector<16x1xf32>
    %cst_28 = arith.constant 3.200000e+01 : f32
    %96 = vector.broadcast %cst_28 : f32 to vector<16x1xf32>
    %97 = arith.divf %95, %96 : vector<16x1xf32>
    %98 = vector.broadcast %90 : vector<16x1xf32> to vector<16x32xf32>
    %99 = arith.subf %82, %98 : vector<16x32xf32>
    %cst_29 = arith.constant 9.99999974E-6 : f32
    %100 = vector.broadcast %cst_29 : f32 to vector<16x1xf32>
    %101 = arith.addf %97, %100 : vector<16x1xf32>
    %102 = math.rsqrt %101 : vector<16x1xf32>
    %103 = vector.broadcast %102 : vector<16x1xf32> to vector<16x32xf32>
    %104 = arith.mulf %99, %103 : vector<16x32xf32>
    %105 = vector.broadcast %84 : vector<1x32xf32> to vector<16x32xf32>
    %106 = arith.mulf %104, %105 : vector<16x32xf32>
    %107 = vector.broadcast %86 : vector<1x32xf32> to vector<16x32xf32>
    %108 = arith.addf %106, %107 : vector<16x32xf32>
    %c0_30 = arith.constant 0 : index
    %c0_31 = arith.constant 0 : index
    %c0_32 = arith.constant 0 : index
    %109 = vector.load %arg7[%c0_30, %c0_31, %c0_32] : memref<2x32x64xf32, #tpu.memory_space<vmem>>, vector<1x32x64xf32>
    %110 = vector.shape_cast %109 : vector<1x32x64xf32> to vector<32x64xf32>
    %cst_33 = arith.constant dense<0.000000e+00> : vector<16x64xf32>
    %111 = tpu.matmul %108, %110, %cst_33 {dimension_numbers = #tpu.dot_dimension_numbers<[1], [0], [0], [1], [0, 0, 1, 1], [], []>} : vector<16x32xf32>, vector<32x64xf32>, vector<16x64xf32> -> vector<16x64xf32>
    %c0_34 = arith.constant 0 : index
    %c0_35 = arith.constant 0 : index
    %c0_36 = arith.constant 0 : index
    %112 = vector.load %arg8[%c0_34, %c0_35, %c0_36] : memref<2x1x64xf32, #tpu.memory_space<vmem>>, vector<1x1x64xf32>
    %113 = vector.shape_cast %112 : vector<1x1x64xf32> to vector<1x64xf32>
    %114 = vector.broadcast %113 : vector<1x64xf32> to vector<16x64xf32>
    %115 = arith.addf %111, %114 : vector<16x64xf32>
    %cst_37 = arith.constant 0.000000e+00 : f32
    %116 = vector.broadcast %cst_37 : f32 to vector<16x64xf32>
    %117 = arith.maximumf %115, %116 : vector<16x64xf32>
    %c0_38 = arith.constant 0 : index
    %c0_39 = arith.constant 0 : index
    %c0_40 = arith.constant 0 : index
    %118 = vector.load %arg9[%c0_38, %c0_39, %c0_40] : memref<2x64x32xf32, #tpu.memory_space<vmem>>, vector<1x64x32xf32>
    %119 = vector.shape_cast %118 : vector<1x64x32xf32> to vector<64x32xf32>
    %cst_41 = arith.constant dense<0.000000e+00> : vector<16x32xf32>
    %120 = tpu.matmul %117, %119, %cst_41 {dimension_numbers = #tpu.dot_dimension_numbers<[1], [0], [0], [1], [0, 0, 1, 1], [], []>} : vector<16x64xf32>, vector<64x32xf32>, vector<16x32xf32> -> vector<16x32xf32>
    %c0_42 = arith.constant 0 : index
    %c0_43 = arith.constant 0 : index
    %c0_44 = arith.constant 0 : index
    %121 = vector.load %arg10[%c0_42, %c0_43, %c0_44] : memref<2x1x32xf32, #tpu.memory_space<vmem>>, vector<1x1x32xf32>
    %122 = vector.shape_cast %121 : vector<1x1x32xf32> to vector<1x32xf32>
    %123 = vector.broadcast %122 : vector<1x32xf32> to vector<16x32xf32>
    %124 = arith.addf %120, %123 : vector<16x32xf32>
    %125 = arith.addf %108, %124 : vector<16x32xf32>
    %c0_45 = arith.constant 0 : index
    %c0_46 = arith.constant 0 : index
    %c0_47 = arith.constant 0 : index
    %126 = vector.load %arg11[%c0_45, %c0_46, %c0_47] : memref<2x1x32xf32, #tpu.memory_space<vmem>>, vector<1x1x32xf32>
    %127 = vector.shape_cast %126 : vector<1x1x32xf32> to vector<1x32xf32>
    %c0_48 = arith.constant 0 : index
    %c0_49 = arith.constant 0 : index
    %c0_50 = arith.constant 0 : index
    %128 = vector.load %arg12[%c0_48, %c0_49, %c0_50] : memref<2x1x32xf32, #tpu.memory_space<vmem>>, vector<1x1x32xf32>
    %129 = vector.shape_cast %128 : vector<1x1x32xf32> to vector<1x32xf32>
    %cst_51 = arith.constant dense<0.000000e+00> : vector<16xf32>
    %130 = vector.multi_reduction <add>, %125, %cst_51 [1] : vector<16x32xf32> to vector<16xf32>
    %131 = vector.shape_cast %130 : vector<16xf32> to vector<16x1xf32>
    %cst_52 = arith.constant 3.200000e+01 : f32
    %132 = vector.broadcast %cst_52 : f32 to vector<16x1xf32>
    %133 = arith.divf %131, %132 : vector<16x1xf32>
    %134 = vector.broadcast %133 : vector<16x1xf32> to vector<16x32xf32>
    %135 = arith.subf %125, %134 : vector<16x32xf32>
    %136 = arith.mulf %135, %135 : vector<16x32xf32>
    %cst_53 = arith.constant dense<0.000000e+00> : vector<16xf32>
    %137 = vector.multi_reduction <add>, %136, %cst_53 [1] : vector<16x32xf32> to vector<16xf32>
    %138 = vector.shape_cast %137 : vector<16xf32> to vector<16x1xf32>
    %cst_54 = arith.constant 3.200000e+01 : f32
    %139 = vector.broadcast %cst_54 : f32 to vector<16x1xf32>
    %140 = arith.divf %138, %139 : vector<16x1xf32>
    %141 = vector.broadcast %133 : vector<16x1xf32> to vector<16x32xf32>
    %142 = arith.subf %125, %141 : vector<16x32xf32>
    %cst_55 = arith.constant 9.99999974E-6 : f32
    %143 = vector.broadcast %cst_55 : f32 to vector<16x1xf32>
    %144 = arith.addf %140, %143 : vector<16x1xf32>
    %145 = math.rsqrt %144 : vector<16x1xf32>
    %146 = vector.broadcast %145 : vector<16x1xf32> to vector<16x32xf32>
    %147 = arith.mulf %142, %146 : vector<16x32xf32>
    %148 = vector.broadcast %127 : vector<1x32xf32> to vector<16x32xf32>
    %149 = arith.mulf %147, %148 : vector<16x32xf32>
    %150 = vector.broadcast %129 : vector<1x32xf32> to vector<16x32xf32>
    %151 = arith.addf %149, %150 : vector<16x32xf32>
    %c1 = arith.constant 1 : index
    %c0_56 = arith.constant 0 : index
    %c0_57 = arith.constant 0 : index
    %152 = vector.load %arg1[%c1, %c0_56, %c0_57] : memref<2x32x96xf32, #tpu.memory_space<vmem>>, vector<1x32x96xf32>
    %153 = vector.shape_cast %152 : vector<1x32x96xf32> to vector<32x96xf32>
    %cst_58 = arith.constant dense<0.000000e+00> : vector<16x96xf32>
    %154 = tpu.matmul %151, %153, %cst_58 {dimension_numbers = #tpu.dot_dimension_numbers<[1], [0], [0], [1], [0, 0, 1, 1], [], []>} : vector<16x32xf32>, vector<32x96xf32>, vector<16x96xf32> -> vector<16x96xf32>
    %c1_59 = arith.constant 1 : index
    %c0_60 = arith.constant 0 : index
    %c0_61 = arith.constant 0 : index
    %155 = vector.load %arg2[%c1_59, %c0_60, %c0_61] : memref<2x1x96xf32, #tpu.memory_space<vmem>>, vector<1x1x96xf32>
    %156 = vector.shape_cast %155 : vector<1x1x96xf32> to vector<1x96xf32>
    %157 = vector.broadcast %156 : vector<1x96xf32> to vector<16x96xf32>
    %158 = arith.addf %154, %157 : vector<16x96xf32>
    %159 = vector.extract_strided_slice %158 {offsets = [0, 0], sizes = [16, 8], strides = [1, 1]} : vector<16x96xf32> to vector<16x8xf32>
    %160 = vector.shape_cast %159 : vector<16x8xf32> to vector<2x8x8xf32>
    %161 = vector.extract_strided_slice %158 {offsets = [0, 8], sizes = [16, 8], strides = [1, 1]} : vector<16x96xf32> to vector<16x8xf32>
    %162 = vector.shape_cast %161 : vector<16x8xf32> to vector<2x8x8xf32>
    %163 = vector.extract_strided_slice %158 {offsets = [0, 16], sizes = [16, 8], strides = [1, 1]} : vector<16x96xf32> to vector<16x8xf32>
    %164 = vector.shape_cast %163 : vector<16x8xf32> to vector<2x8x8xf32>
    %165 = vector.extract_strided_slice %158 {offsets = [0, 24], sizes = [16, 8], strides = [1, 1]} : vector<16x96xf32> to vector<16x8xf32>
    %166 = vector.shape_cast %165 : vector<16x8xf32> to vector<2x8x8xf32>
    %167 = tpu.concatenate %160, %162, %164, %166 in 0 : vector<2x8x8xf32>, vector<2x8x8xf32>, vector<2x8x8xf32>, vector<2x8x8xf32> -> vector<8x8x8xf32>
    %168 = vector.extract_strided_slice %158 {offsets = [0, 32], sizes = [16, 8], strides = [1, 1]} : vector<16x96xf32> to vector<16x8xf32>
    %169 = vector.shape_cast %168 : vector<16x8xf32> to vector<2x8x8xf32>
    %170 = vector.extract_strided_slice %158 {offsets = [0, 40], sizes = [16, 8], strides = [1, 1]} : vector<16x96xf32> to vector<16x8xf32>
    %171 = vector.shape_cast %170 : vector<16x8xf32> to vector<2x8x8xf32>
    %172 = vector.extract_strided_slice %158 {offsets = [0, 48], sizes = [16, 8], strides = [1, 1]} : vector<16x96xf32> to vector<16x8xf32>
    %173 = vector.shape_cast %172 : vector<16x8xf32> to vector<2x8x8xf32>
    %174 = vector.extract_strided_slice %158 {offsets = [0, 56], sizes = [16, 8], strides = [1, 1]} : vector<16x96xf32> to vector<16x8xf32>
    %175 = vector.shape_cast %174 : vector<16x8xf32> to vector<2x8x8xf32>
    %176 = tpu.concatenate %169, %171, %173, %175 in 0 : vector<2x8x8xf32>, vector<2x8x8xf32>, vector<2x8x8xf32>, vector<2x8x8xf32> -> vector<8x8x8xf32>
    %177 = vector.extract_strided_slice %158 {offsets = [0, 64], sizes = [16, 8], strides = [1, 1]} : vector<16x96xf32> to vector<16x8xf32>
    %178 = vector.shape_cast %177 : vector<16x8xf32> to vector<2x8x8xf32>
    %179 = vector.extract_strided_slice %158 {offsets = [0, 72], sizes = [16, 8], strides = [1, 1]} : vector<16x96xf32> to vector<16x8xf32>
    %180 = vector.shape_cast %179 : vector<16x8xf32> to vector<2x8x8xf32>
    %181 = vector.extract_strided_slice %158 {offsets = [0, 80], sizes = [16, 8], strides = [1, 1]} : vector<16x96xf32> to vector<16x8xf32>
    %182 = vector.shape_cast %181 : vector<16x8xf32> to vector<2x8x8xf32>
    %183 = vector.extract_strided_slice %158 {offsets = [0, 88], sizes = [16, 8], strides = [1, 1]} : vector<16x96xf32> to vector<16x8xf32>
    %184 = vector.shape_cast %183 : vector<16x8xf32> to vector<2x8x8xf32>
    %185 = tpu.concatenate %178, %180, %182, %184 in 0 : vector<2x8x8xf32>, vector<2x8x8xf32>, vector<2x8x8xf32>, vector<2x8x8xf32> -> vector<8x8x8xf32>
    "tpu.trace_start"() <{level = 10 : i32, message = "gqd,gkd->gqk"}> : () -> ()
    %cst_62 = arith.constant dense<0.000000e+00> : vector<8x8x8xf32>
    %186 = tpu.matmul %167, %176, %cst_62 {dimension_numbers = #tpu.dot_dimension_numbers<[2], [2], [1], [1], [0, 0, 0, 1, 1, 1], [0], [0]>} : vector<8x8x8xf32>, vector<8x8x8xf32>, vector<8x8x8xf32> -> vector<8x8x8xf32>
    "tpu.trace_stop"() : () -> ()
    %cst_63 = arith.constant 0.353553385 : f32
    %187 = vector.broadcast %cst_63 : f32 to vector<8x8x8xf32>
    %188 = arith.mulf %186, %187 : vector<8x8x8xf32>
    %cst_64 = arith.constant dense<0xFF800000> : vector<8x8xf32>
    %189 = vector.multi_reduction <maximumf>, %188, %cst_64 [2] : vector<8x8x8xf32> to vector<8x8xf32>
    %190 = vector.shape_cast %189 : vector<8x8xf32> to vector<8x8x1xf32>
    %191 = vector.broadcast %190 : vector<8x8x1xf32> to vector<8x8x8xf32>
    %192 = arith.subf %188, %191 : vector<8x8x8xf32>
    %193 = math.exp %192 : vector<8x8x8xf32>
    %cst_65 = arith.constant dense<0.000000e+00> : vector<8x8xf32>
    %194 = vector.multi_reduction <add>, %193, %cst_65 [2] : vector<8x8x8xf32> to vector<8x8xf32>
    %195 = vector.shape_cast %194 : vector<8x8xf32> to vector<8x8x1xf32>
    %196 = tpu.reciprocal %195 : vector<8x8x1xf32> -> vector<8x8x1xf32>
    %197 = vector.broadcast %196 : vector<8x8x1xf32> to vector<8x8x8xf32>
    %198 = arith.mulf %193, %197 : vector<8x8x8xf32>
    %199 = vector.extract_strided_slice %198 {offsets = [0, 0, 0], sizes = [1, 8, 8], strides = [1, 1, 1]} : vector<8x8x8xf32> to vector<1x8x8xf32>
    %200 = vector.shape_cast %199 : vector<1x8x8xf32> to vector<8x8xf32>
    %201 = vector.extract_strided_slice %198 {offsets = [1, 0, 0], sizes = [1, 8, 8], strides = [1, 1, 1]} : vector<8x8x8xf32> to vector<1x8x8xf32>
    %202 = vector.shape_cast %201 : vector<1x8x8xf32> to vector<8x8xf32>
    %203 = vector.extract_strided_slice %198 {offsets = [2, 0, 0], sizes = [1, 8, 8], strides = [1, 1, 1]} : vector<8x8x8xf32> to vector<1x8x8xf32>
    %204 = vector.shape_cast %203 : vector<1x8x8xf32> to vector<8x8xf32>
    %205 = vector.extract_strided_slice %198 {offsets = [3, 0, 0], sizes = [1, 8, 8], strides = [1, 1, 1]} : vector<8x8x8xf32> to vector<1x8x8xf32>
    %206 = vector.shape_cast %205 : vector<1x8x8xf32> to vector<8x8xf32>
    %207 = vector.extract_strided_slice %198 {offsets = [4, 0, 0], sizes = [1, 8, 8], strides = [1, 1, 1]} : vector<8x8x8xf32> to vector<1x8x8xf32>
    %208 = vector.shape_cast %207 : vector<1x8x8xf32> to vector<8x8xf32>
    %209 = vector.extract_strided_slice %198 {offsets = [5, 0, 0], sizes = [1, 8, 8], strides = [1, 1, 1]} : vector<8x8x8xf32> to vector<1x8x8xf32>
    %210 = vector.shape_cast %209 : vector<1x8x8xf32> to vector<8x8xf32>
    %211 = vector.extract_strided_slice %198 {offsets = [6, 0, 0], sizes = [1, 8, 8], strides = [1, 1, 1]} : vector<8x8x8xf32> to vector<1x8x8xf32>
    %212 = vector.shape_cast %211 : vector<1x8x8xf32> to vector<8x8xf32>
    %213 = vector.extract_strided_slice %198 {offsets = [7, 0, 0], sizes = [1, 8, 8], strides = [1, 1, 1]} : vector<8x8x8xf32> to vector<1x8x8xf32>
    %214 = vector.shape_cast %213 : vector<1x8x8xf32> to vector<8x8xf32>
    %215 = tpu.concatenate %200, %202, %204, %206, %208, %210, %212, %214 in 1 : vector<8x8xf32>, vector<8x8xf32>, vector<8x8xf32>, vector<8x8xf32>, vector<8x8xf32>, vector<8x8xf32>, vector<8x8xf32>, vector<8x8xf32> -> vector<8x64xf32>
    "tpu.trace_start"() <{level = 10 : i32, message = "gqk,gkd->gqd"}> : () -> ()
    %cst_66 = arith.constant dense<0.000000e+00> : vector<8x8x8xf32>
    %216 = tpu.matmul %198, %185, %cst_66 {dimension_numbers = #tpu.dot_dimension_numbers<[2], [1], [1], [2], [0, 0, 0, 1, 1, 2], [0], [0]>} : vector<8x8x8xf32>, vector<8x8x8xf32>, vector<8x8x8xf32> -> vector<8x8x8xf32>
    "tpu.trace_stop"() : () -> ()
    %217 = vector.extract_strided_slice %216 {offsets = [0, 0, 0], sizes = [2, 8, 8], strides = [1, 1, 1]} : vector<8x8x8xf32> to vector<2x8x8xf32>
    %218 = vector.shape_cast %217 : vector<2x8x8xf32> to vector<16x8xf32>
    %219 = vector.extract_strided_slice %216 {offsets = [2, 0, 0], sizes = [2, 8, 8], strides = [1, 1, 1]} : vector<8x8x8xf32> to vector<2x8x8xf32>
    %220 = vector.shape_cast %219 : vector<2x8x8xf32> to vector<16x8xf32>
    %221 = vector.extract_strided_slice %216 {offsets = [4, 0, 0], sizes = [2, 8, 8], strides = [1, 1, 1]} : vector<8x8x8xf32> to vector<2x8x8xf32>
    %222 = vector.shape_cast %221 : vector<2x8x8xf32> to vector<16x8xf32>
    %223 = vector.extract_strided_slice %216 {offsets = [6, 0, 0], sizes = [2, 8, 8], strides = [1, 1, 1]} : vector<8x8x8xf32> to vector<2x8x8xf32>
    %224 = vector.shape_cast %223 : vector<2x8x8xf32> to vector<16x8xf32>
    %225 = tpu.concatenate %218, %220, %222, %224 in 1 : vector<16x8xf32>, vector<16x8xf32>, vector<16x8xf32>, vector<16x8xf32> -> vector<16x32xf32>
    %c1_67 = arith.constant 1 : index
    %c0_68 = arith.constant 0 : index
    %c0_69 = arith.constant 0 : index
    %226 = vector.load %arg3[%c1_67, %c0_68, %c0_69] : memref<2x32x32xf32, #tpu.memory_space<vmem>>, vector<1x32x32xf32>
    %227 = vector.shape_cast %226 : vector<1x32x32xf32> to vector<32x32xf32>
    %cst_70 = arith.constant dense<0.000000e+00> : vector<16x32xf32>
    %228 = tpu.matmul %225, %227, %cst_70 {dimension_numbers = #tpu.dot_dimension_numbers<[1], [0], [0], [1], [0, 0, 1, 1], [], []>} : vector<16x32xf32>, vector<32x32xf32>, vector<16x32xf32> -> vector<16x32xf32>
    %c1_71 = arith.constant 1 : index
    %c0_72 = arith.constant 0 : index
    %c0_73 = arith.constant 0 : index
    %229 = vector.load %arg4[%c1_71, %c0_72, %c0_73] : memref<2x1x32xf32, #tpu.memory_space<vmem>>, vector<1x1x32xf32>
    %230 = vector.shape_cast %229 : vector<1x1x32xf32> to vector<1x32xf32>
    %231 = vector.broadcast %230 : vector<1x32xf32> to vector<16x32xf32>
    %232 = arith.addf %228, %231 : vector<16x32xf32>
    %233 = arith.addf %151, %232 : vector<16x32xf32>
    %c1_74 = arith.constant 1 : index
    %c0_75 = arith.constant 0 : index
    %c0_76 = arith.constant 0 : index
    %234 = vector.load %arg5[%c1_74, %c0_75, %c0_76] : memref<2x1x32xf32, #tpu.memory_space<vmem>>, vector<1x1x32xf32>
    %235 = vector.shape_cast %234 : vector<1x1x32xf32> to vector<1x32xf32>
    %c1_77 = arith.constant 1 : index
    %c0_78 = arith.constant 0 : index
    %c0_79 = arith.constant 0 : index
    %236 = vector.load %arg6[%c1_77, %c0_78, %c0_79] : memref<2x1x32xf32, #tpu.memory_space<vmem>>, vector<1x1x32xf32>
    %237 = vector.shape_cast %236 : vector<1x1x32xf32> to vector<1x32xf32>
    %cst_80 = arith.constant dense<0.000000e+00> : vector<16xf32>
    %238 = vector.multi_reduction <add>, %233, %cst_80 [1] : vector<16x32xf32> to vector<16xf32>
    %239 = vector.shape_cast %238 : vector<16xf32> to vector<16x1xf32>
    %cst_81 = arith.constant 3.200000e+01 : f32
    %240 = vector.broadcast %cst_81 : f32 to vector<16x1xf32>
    %241 = arith.divf %239, %240 : vector<16x1xf32>
    %242 = vector.broadcast %241 : vector<16x1xf32> to vector<16x32xf32>
    %243 = arith.subf %233, %242 : vector<16x32xf32>
    %244 = arith.mulf %243, %243 : vector<16x32xf32>
    %cst_82 = arith.constant dense<0.000000e+00> : vector<16xf32>
    %245 = vector.multi_reduction <add>, %244, %cst_82 [1] : vector<16x32xf32> to vector<16xf32>
    %246 = vector.shape_cast %245 : vector<16xf32> to vector<16x1xf32>
    %cst_83 = arith.constant 3.200000e+01 : f32
    %247 = vector.broadcast %cst_83 : f32 to vector<16x1xf32>
    %248 = arith.divf %246, %247 : vector<16x1xf32>
    %249 = vector.broadcast %241 : vector<16x1xf32> to vector<16x32xf32>
    %250 = arith.subf %233, %249 : vector<16x32xf32>
    %cst_84 = arith.constant 9.99999974E-6 : f32
    %251 = vector.broadcast %cst_84 : f32 to vector<16x1xf32>
    %252 = arith.addf %248, %251 : vector<16x1xf32>
    %253 = math.rsqrt %252 : vector<16x1xf32>
    %254 = vector.broadcast %253 : vector<16x1xf32> to vector<16x32xf32>
    %255 = arith.mulf %250, %254 : vector<16x32xf32>
    %256 = vector.broadcast %235 : vector<1x32xf32> to vector<16x32xf32>
    %257 = arith.mulf %255, %256 : vector<16x32xf32>
    %258 = vector.broadcast %237 : vector<1x32xf32> to vector<16x32xf32>
    %259 = arith.addf %257, %258 : vector<16x32xf32>
    %c1_85 = arith.constant 1 : index
    %c0_86 = arith.constant 0 : index
    %c0_87 = arith.constant 0 : index
    %260 = vector.load %arg7[%c1_85, %c0_86, %c0_87] : memref<2x32x64xf32, #tpu.memory_space<vmem>>, vector<1x32x64xf32>
    %261 = vector.shape_cast %260 : vector<1x32x64xf32> to vector<32x64xf32>
    %cst_88 = arith.constant dense<0.000000e+00> : vector<16x64xf32>
    %262 = tpu.matmul %259, %261, %cst_88 {dimension_numbers = #tpu.dot_dimension_numbers<[1], [0], [0], [1], [0, 0, 1, 1], [], []>} : vector<16x32xf32>, vector<32x64xf32>, vector<16x64xf32> -> vector<16x64xf32>
    %c1_89 = arith.constant 1 : index
    %c0_90 = arith.constant 0 : index
    %c0_91 = arith.constant 0 : index
    %263 = vector.load %arg8[%c1_89, %c0_90, %c0_91] : memref<2x1x64xf32, #tpu.memory_space<vmem>>, vector<1x1x64xf32>
    %264 = vector.shape_cast %263 : vector<1x1x64xf32> to vector<1x64xf32>
    %265 = vector.broadcast %264 : vector<1x64xf32> to vector<16x64xf32>
    %266 = arith.addf %262, %265 : vector<16x64xf32>
    %cst_92 = arith.constant 0.000000e+00 : f32
    %267 = vector.broadcast %cst_92 : f32 to vector<16x64xf32>
    %268 = arith.maximumf %266, %267 : vector<16x64xf32>
    %c1_93 = arith.constant 1 : index
    %c0_94 = arith.constant 0 : index
    %c0_95 = arith.constant 0 : index
    %269 = vector.load %arg9[%c1_93, %c0_94, %c0_95] : memref<2x64x32xf32, #tpu.memory_space<vmem>>, vector<1x64x32xf32>
    %270 = vector.shape_cast %269 : vector<1x64x32xf32> to vector<64x32xf32>
    %cst_96 = arith.constant dense<0.000000e+00> : vector<16x32xf32>
    %271 = tpu.matmul %268, %270, %cst_96 {dimension_numbers = #tpu.dot_dimension_numbers<[1], [0], [0], [1], [0, 0, 1, 1], [], []>} : vector<16x64xf32>, vector<64x32xf32>, vector<16x32xf32> -> vector<16x32xf32>
    %c1_97 = arith.constant 1 : index
    %c0_98 = arith.constant 0 : index
    %c0_99 = arith.constant 0 : index
    %272 = vector.load %arg10[%c1_97, %c0_98, %c0_99] : memref<2x1x32xf32, #tpu.memory_space<vmem>>, vector<1x1x32xf32>
    %273 = vector.shape_cast %272 : vector<1x1x32xf32> to vector<1x32xf32>
    %274 = vector.broadcast %273 : vector<1x32xf32> to vector<16x32xf32>
    %275 = arith.addf %271, %274 : vector<16x32xf32>
    %276 = arith.addf %259, %275 : vector<16x32xf32>
    %c1_100 = arith.constant 1 : index
    %c0_101 = arith.constant 0 : index
    %c0_102 = arith.constant 0 : index
    %277 = vector.load %arg11[%c1_100, %c0_101, %c0_102] : memref<2x1x32xf32, #tpu.memory_space<vmem>>, vector<1x1x32xf32>
    %278 = vector.shape_cast %277 : vector<1x1x32xf32> to vector<1x32xf32>
    %c1_103 = arith.constant 1 : index
    %c0_104 = arith.constant 0 : index
    %c0_105 = arith.constant 0 : index
    %279 = vector.load %arg12[%c1_103, %c0_104, %c0_105] : memref<2x1x32xf32, #tpu.memory_space<vmem>>, vector<1x1x32xf32>
    %280 = vector.shape_cast %279 : vector<1x1x32xf32> to vector<1x32xf32>
    %cst_106 = arith.constant dense<0.000000e+00> : vector<16xf32>
    %281 = vector.multi_reduction <add>, %276, %cst_106 [1] : vector<16x32xf32> to vector<16xf32>
    %282 = vector.shape_cast %281 : vector<16xf32> to vector<16x1xf32>
    %cst_107 = arith.constant 3.200000e+01 : f32
    %283 = vector.broadcast %cst_107 : f32 to vector<16x1xf32>
    %284 = arith.divf %282, %283 : vector<16x1xf32>
    %285 = vector.broadcast %284 : vector<16x1xf32> to vector<16x32xf32>
    %286 = arith.subf %276, %285 : vector<16x32xf32>
    %287 = arith.mulf %286, %286 : vector<16x32xf32>
    %cst_108 = arith.constant dense<0.000000e+00> : vector<16xf32>
    %288 = vector.multi_reduction <add>, %287, %cst_108 [1] : vector<16x32xf32> to vector<16xf32>
    %289 = vector.shape_cast %288 : vector<16xf32> to vector<16x1xf32>
    %cst_109 = arith.constant 3.200000e+01 : f32
    %290 = vector.broadcast %cst_109 : f32 to vector<16x1xf32>
    %291 = arith.divf %289, %290 : vector<16x1xf32>
    %292 = vector.broadcast %284 : vector<16x1xf32> to vector<16x32xf32>
    %293 = arith.subf %276, %292 : vector<16x32xf32>
    %cst_110 = arith.constant 9.99999974E-6 : f32
    %294 = vector.broadcast %cst_110 : f32 to vector<16x1xf32>
    %295 = arith.addf %291, %294 : vector<16x1xf32>
    %296 = math.rsqrt %295 : vector<16x1xf32>
    %297 = vector.broadcast %296 : vector<16x1xf32> to vector<16x32xf32>
    %298 = arith.mulf %293, %297 : vector<16x32xf32>
    %299 = vector.broadcast %278 : vector<1x32xf32> to vector<16x32xf32>
    %300 = arith.mulf %298, %299 : vector<16x32xf32>
    %301 = vector.broadcast %280 : vector<1x32xf32> to vector<16x32xf32>
    %302 = arith.addf %300, %301 : vector<16x32xf32>
    %c0_111 = arith.constant 0 : index
    %c0_112 = arith.constant 0 : index
    %303 = vector.load %arg13[%c0_111, %c0_112] : memref<1x32xf32, #tpu.memory_space<vmem>>, vector<1x32xf32>
    %c0_113 = arith.constant 0 : index
    %c0_114 = arith.constant 0 : index
    %304 = vector.load %arg14[%c0_113, %c0_114] : memref<1x32xf32, #tpu.memory_space<vmem>>, vector<1x32xf32>
    %cst_115 = arith.constant dense<0.000000e+00> : vector<16xf32>
    %305 = vector.multi_reduction <add>, %302, %cst_115 [1] : vector<16x32xf32> to vector<16xf32>
    %306 = vector.shape_cast %305 : vector<16xf32> to vector<16x1xf32>
    %cst_116 = arith.constant 3.200000e+01 : f32
    %307 = vector.broadcast %cst_116 : f32 to vector<16x1xf32>
    %308 = arith.divf %306, %307 : vector<16x1xf32>
    %309 = vector.broadcast %308 : vector<16x1xf32> to vector<16x32xf32>
    %310 = arith.subf %302, %309 : vector<16x32xf32>
    %311 = arith.mulf %310, %310 : vector<16x32xf32>
    %cst_117 = arith.constant dense<0.000000e+00> : vector<16xf32>
    %312 = vector.multi_reduction <add>, %311, %cst_117 [1] : vector<16x32xf32> to vector<16xf32>
    %313 = vector.shape_cast %312 : vector<16xf32> to vector<16x1xf32>
    %cst_118 = arith.constant 3.200000e+01 : f32
    %314 = vector.broadcast %cst_118 : f32 to vector<16x1xf32>
    %315 = arith.divf %313, %314 : vector<16x1xf32>
    %316 = vector.broadcast %308 : vector<16x1xf32> to vector<16x32xf32>
    %317 = arith.subf %302, %316 : vector<16x32xf32>
    %cst_119 = arith.constant 9.99999974E-6 : f32
    %318 = vector.broadcast %cst_119 : f32 to vector<16x1xf32>
    %319 = arith.addf %315, %318 : vector<16x1xf32>
    %320 = math.rsqrt %319 : vector<16x1xf32>
    %321 = vector.broadcast %320 : vector<16x1xf32> to vector<16x32xf32>
    %322 = arith.mulf %317, %321 : vector<16x32xf32>
    %323 = vector.broadcast %303 : vector<1x32xf32> to vector<16x32xf32>
    %324 = arith.mulf %322, %323 : vector<16x32xf32>
    %325 = vector.broadcast %304 : vector<1x32xf32> to vector<16x32xf32>
    %326 = arith.addf %324, %325 : vector<16x32xf32>
    %c0_120 = arith.constant 0 : index
    %c0_121 = arith.constant 0 : index
    %327 = vector.load %arg15[%c0_120, %c0_121] : memref<16x32xf32, #tpu.memory_space<vmem>>, vector<16x32xf32>
    tpu.vector_store %arg15[%c0_120, %c0_121], %326 {strides = array<i32>} : memref<16x32xf32, #tpu.memory_space<vmem>>, vector<16x32xf32>,
    %328 = tpu.concatenate %64, %215 in 1 : vector<8x64xf32>, vector<8x64xf32> -> vector<8x128xf32>
    %c0_122 = arith.constant 0 : index
    %c0_123 = arith.constant 0 : index
    %329 = vector.load %arg16[%c0_122, %c0_123] : memref<8x128xf32, #tpu.memory_space<vmem>>, vector<8x128xf32>
    tpu.vector_store %arg16[%c0_122, %c0_123], %328 {strides = array<i32>} : memref<8x128xf32, #tpu.memory_space<vmem>>, vector<8x128xf32>,
    return
  }
}

</mosaic_0001>

<bundles_post_ra>
// kernel: encoder_forward.1
= control target key start
LH: loop header
LB: loop body
LE: loop exit
PB: predicated region body
PF: predicated region fallthrough
CT: control target
= control target key end

     0   :  { %s3461_s0 = inlined_call_operand.hbm [shape: f32[16,32], index: 0, kind: input, shape index: {}]   ;;  %s3462_s1 = inlined_call_operand.vmem [shape: f32[2,32,96], index: 1, kind: input, shape index: {}]   ;;  %s3463_s2 = inlined_call_operand.vmem [shape: f32[2,1,96], index: 2, kind: input, shape index: {}]   ;;  %s3464_s3 = inlined_call_operand.vmem [shape: f32[2,32,32], index: 3, kind: input, shape index: {}]   ;;  %s3465_s4 = inlined_call_operand.hbm [shape: f32[2,1,32], index: 4, kind: input, shape index: {}]   ;;  %s3466_s5 = inlined_call_operand.vmem [shape: f32[2,1,32], index: 5, kind: input, shape index: {}]   ;;  %s3467_s6 = inlined_call_operand.hbm [shape: f32[2,1,32], index: 6, kind: input, shape index: {}]   ;;  %s3468_s7 = inlined_call_operand.vmem [shape: f32[2,32,64], index: 7, kind: input, shape index: {}]   ;;  %s3469_s8 = inlined_call_operand.hbm [shape: f32[2,1,64], index: 8, kind: input, shape index: {}]   ;;  %s3470_s9 = inlined_call_operand.vmem [shape: f32[2,64,32], index: 9, kind: input, shape index: {}]   ;;  %s3471_s10 = inlined_call_operand.hbm [shape: f32[2,1,32], index: 10, kind: input, shape index: {}]   ;;  %s3472_s11 = inlined_call_operand.vmem [shape: f32[2,1,32], index: 11, kind: input, shape index: {}]   ;;  %s3473_s12 = inlined_call_operand.vmem [shape: f32[2,1,32], index: 12, kind: input, shape index: {}]   ;;  %s3474_s13 = inlined_call_operand.hbm [shape: f32[1,32], index: 13, kind: input, shape index: {}]   ;;  %s3475_s14 = inlined_call_operand.hbm [shape: f32[1,32], index: 14, kind: input, shape index: {}]   ;;  %s3476_s15 = inlined_call_operand.hbm [shape: f32[16,32], index: 15, kind: output, shape index: {0}]   ;;  %s3477_s16 = inlined_call_operand.vmem [shape: f32[8,128], index: 16, kind: output, shape index: {1}]  }
   0x1   :  { %3478 = sst [smem:[#allocation20_spill]] %s3461_s0 }
   0x2   :  { %22 = vsyncpa [#allocation3], 0 }
   0x3   :  { %23 = vsyncpa [#allocation6], 0 }
   0x4   :  { %24 = vsyncpa [#allocation9], 0 }
   0x5   :  { %25 = vsyncpa [#allocation12], 0  ;;  %s50_s23 = sshll.u32 %s3465_s4, 4  ;;  %s51_s23 = int_to_ptr.hbm [resolvable:$true] %s50_s23 }
   0x6   :  { %26 = vsyncpa [#allocation4], 0  ;;  %s2640_s24 = smov [#allocation5]   ;;  %s80_s28 = sshll.u32 %s3469_s8, 4  ;;  %s81_s28 = int_to_ptr.hbm [resolvable:$true] %s80_s28 }
   0x7   :  { %s52_s25 = sshll.u32 %s2640_s24, 4  ;;  %s2641_s29 = smov 16   ;;  %s53_s25 = int_to_ptr.vmem [resolvable:$true] %s52_s25 }
   0x8   :  { %s2642_s30 = smov 1   ;;  %s2643_s0 = smov [#allocation8]  }
   0x9   :  { %58 = dma.hbm_to_vmem [thread:$0]  %s51_s23, 32, %s53_s25, [#allocation6], %s2641_s29, %s2641_s29, %s2642_s30  }
   0xa   :  { %s82_s17 = sshll.u32 %s2643_s0, 4  ;;  %s113_s19 = sshll.u32 %s3474_s13, 4  ;;  %s83_s17 = int_to_ptr.vmem [resolvable:$true] %s82_s17  ;;  %s114_s19 = int_to_ptr.hbm [resolvable:$true] %s113_s19 }
   0xb   :  { %88 = dma.hbm_to_vmem [thread:$0]  %s81_s28, 32, %s83_s17, [#allocation9], %s2641_s29, %s2641_s29, %s2642_s30  }
   0xc   :  { %s3479_s21 = sld [smem:[#allocation20_spill]]  ;;  %s2644_s24 = smov [#allocation11]  }
   0xd   :  { %s115_s26 = sshll.u32 %s2644_s24, 4  ;;  %s2645_s23 = smov [#allocation2]   ;;  %s116_s26 = int_to_ptr.vmem [resolvable:$true] %s115_s26 }
   0xe   :  { %118 = dma.hbm_to_vmem [thread:$0]  %s114_s19, 16, %s116_s26, [#allocation12]  }
   0xf   :  { %s33_s25 = sshll.u32 %s2645_s23, 4  ;;  %s2646_s27 = smov 128   ;;  %s34_s25 = int_to_ptr.vmem [resolvable:$true] %s33_s25 }
  0x10   :  { %s2647_s13 = smov 8   ;;  %s65_s17 = sshll.u32 %s3467_s6, 4  ;;  %s66_s17 = int_to_ptr.hbm [resolvable:$true] %s65_s17 }
  0x11   :  { %s2648_s18 = smov [#allocation7]   ;;  %s95_s19 = sshll.u32 %s3471_s10, 4  ;;  %s96_s19 = int_to_ptr.hbm [resolvable:$true] %s95_s19 }
  0x12   :  { %s31_s22 = sshll.u32 %s3479_s21, 4  ;;  %s67_s4 = sshll.u32 %s2648_s18, 4  ;;  %s32_s22 = int_to_ptr.hbm [resolvable:$true] %s31_s22  ;;  %s68_s4 = int_to_ptr.vmem [resolvable:$true] %s67_s4 }
  0x13   :  { %39 = dma.hbm_to_vmem [thread:$0]  %s32_s22, 256, %s34_s25, [#allocation3], %s2646_s27, %s2646_s27, %s2647_s13  }
  0x14   :  { %73 = dma.hbm_to_vmem [thread:$0]  %s66_s17, 32, %s68_s4, [#allocation6], %s2641_s29, %s2641_s29, %s2642_s30  }
  0x15   :  { %s2649_s21 = smov [#allocation10]   ;;  %s124_s23 = sshll.u32 %s3475_s14, 4  ;;  %s125_s23 = int_to_ptr.hbm [resolvable:$true] %s124_s23 }
  0x16   :  { %s97_s24 = sshll.u32 %s2649_s21, 4  ;;  %s2650_s6 = smov [#allocation13]   ;;  %s98_s24 = int_to_ptr.vmem [resolvable:$true] %s97_s24 }
  0x17   :  { %103 = dma.hbm_to_vmem [thread:$0]  %s96_s19, 32, %s98_s24, [#allocation9], %s2641_s29, %s2641_s29, %s2642_s30  }
  0x18   :  { %s126_s25 = sshll.u32 %s2650_s6, 4  ;;  %s127_s25 = int_to_ptr.vmem [resolvable:$true] %s126_s25 }
  0x19   :  { %129 = dma.hbm_to_vmem [thread:$0]  %s125_s23, 16, %s127_s25, [#allocation12]  }
  0x1a   :  { %2630 = dma.done.wait [#allocation3], 256  }
  0x1b   :  { %2631 = vsyncadd [#allocation3], 4294967040 }
  0x1c   :  { %2632 = dma.done.wait [#allocation6], 64  }
  0x1d   :  { %2633 = vsyncadd [#allocation6], 4294967232 }
  0x1e   :  { %2634 = dma.done.wait [#allocation9], 64  }
  0x1f   :  { %2635 = vsyncadd [#allocation9], 4294967232 }
  0x20   :  { %2636 = dma.done.wait [#allocation12], 32  }
  0x21   :  { %2637 = vsyncadd [#allocation12], 4294967264  ;;  %v163_v0 = vld [vmem:[%s3462_s1 + $0x18] sm:$0xff]  ;;  %v162_v1 = vld [vmem:[%s3462_s1 + $0x10] sm:$0xff]  ;;  %vm168_vm0 = vcmask 261120   ;;  %s2651_s19 = smov 104  }
  0x22   :  { %187 = vmatpush.msra.mxu0 %v163_v0  ;;  %v161_v2 = vld [vmem:[%s3462_s1 + $0x8] sm:$0xff]  ;;  %v160_v3 = vld [vmem:[%s3462_s1] sm:$0xff]  ;;  %s2652_s21 = smov 120   ;;  %s2653_s24 = smov 112   ;;  %vm214_vm1 = vcmask 64512  }
  0x23   :  { %v2796_v4 = vld [vmem:[#allocation2] sm:$0xff]  ;;  %v2800_v5 = vld [vmem:[#allocation2 + $0x8] sm:$0xff]  ;;  %s2654_s22 = smov 96   ;;  %s2655_s26 = smov 64  }
  0x24   :  { %188 = vmatpush.msra.mxu0 %v162_v1  ;;  %v2334_v6 = vld [vmem:[%s3463_s2] ss:$0 sm:$0xff]  ;;  %s2656_s23 = smov 24   ;;  %s2659_s30 = smov 32  }
  0x26   :  { %189 = vmatpush.msra.mxu0 %v161_v2 }
  0x28   :  { %190 = vmatpush.msra.mxu0 %v160_v3 }
  0x29   :  { %2193 = vmatmul.msk.f32.vlgmr.msra.gmra.mxu0 %vm168_vm0, %v2796_v4 }
  0x31   :  { %2194 = vmatmul.msk.f32.gmra.mxu0 %vm168_vm0, %v2800_v5 }
  0xa6   :  { %v192_v7 = vpop.f32.mrf.mxu0 }
  0xa7   :  { %v2807_v8 = vadd.f32 %v2334_v6, %v192_v7 }
  0xa9   :  { %208 = vrot.lane.b32.xlu2 %v2807_v8, %s2651_s19  ;;  %200 = vrot.lane.b32.xlu0 %v2807_v8, %s2652_s21 }
  0xae   :  { %v195_v9 = vpop.f32.mrf.mxu0 }
  0xaf   :  { %v2813_v10 = vadd.f32 %v2334_v6, %v195_v9 }
  0xb1   :  { %202 = vrot.lane.b32.xlu1 %v2813_v10, %s2652_s21  ;;  %206 = vrot.lane.b32.xlu2 %v2813_v10, %s2653_s24 }
  0xb2   :  { %204 = vrot.lane.b32.xlu0 %v2807_v8, %s2653_s24 }
  0xb9   :  { %210 = vrot.lane.b32.xlu1 %v2813_v10, %s2651_s19 }
  0xba   :  { %239 = vrot.lane.b32.xlu0 %v2813_v10, %s2654_s22 }
  0xc1   :  { %212 = vrot.lane.b32.xlu1 %v2807_v8, %s2654_s22 }
 0x103   :  { %v2831_v12 = vpop.permute.xlu2 %208 }
 0x10b   :  { %v2841_v15 = vpop.permute.xlu2 %206 }
 0x11b   :  { %v2827_v11 = vpop.permute.xlu0 %200 }
 0x11c   :  { %265 = vrot.lane.b32.xlu2 %v2827_v11, %s2654_s22  ;;  %v2304_v54 = vpack.i.bf16 %v2827_v11, %v2807_v8 }
 0x123   :  { %v2833_v13 = vpop.permute.xlu1 %202 }
 0x124   :  { %v2835_v14 = vpop.permute.xlu0 %204  ;;  %291 = vrot.lane.b32.xlu1 %v2833_v13, %s2654_s22 }
 0x125   :  { %317 = vrot.lane.b32.xlu0 %v2835_v14, %s2654_s22  ;;  %v2309_v55 = vpack.i.bf16 %v2833_v13, %v2835_v14 }
 0x12b   :  { %v2843_v16 = vpop.permute.xlu1 %210 }
 0x12c   :  { %v240_v17 = vpop.permute.xlu0 %239  ;;  %343 = vrot.lane.b32.xlu1 %v2841_v15, %s2654_s22  ;;  %395 = vrot.lane.b32.xlu2 %v2843_v16, %s2654_s22 }
 0x12d   :  { %369 = vrot.lane.b32.xlu0 %v2831_v12, %s2654_s22  ;;  %2197 = vmatpush.xpose.msk.msra.mxu3 %vm214_vm1, %v240_v17 }
 0x130   :  { %2198 = vmatmul.msk.f32.vlgmr.msra.gmra.mxu3 %vm214_vm1, %v2813_v10 }
 0x133   :  { %v213_v18 = vpop.permute.xlu1 %212 }
 0x134   :  { %2195 = vmatpush.xpose.msk.msra.mxu1 %vm214_vm1, %v213_v18 }
 0x137   :  { %2196 = vmatmul.msk.f32.vlgmr.msra.gmra.mxu1 %vm214_vm1, %v2807_v8 }
 0x176   :  { %v266_v19 = vpop.permute.xlu2 %265 }
 0x177   :  { %2199 = vmatpush.xpose.msk.msrb.mxu3 %vm214_vm1, %v266_v19 }
 0x17a   :  { %2200 = vmatmul.msk.f32.vlgmr.msrb.gmra.mxu3 %vm214_vm1, %v2827_v11 }
 0x186   :  { %v396_v22 = vpop.permute.xlu2 %395 }
 0x196   :  { %v292_v20 = vpop.permute.xlu1 %291 }
 0x197   :  { %v318_v21 = vpop.permute.xlu0 %317  ;;  %2201 = vmatpush.xpose.msk.msrb.mxu1 %vm214_vm1, %v292_v20 }
 0x198   :  { %2203 = vmatpush.xpose.msk.msra.mxu2 %vm214_vm1, %v318_v21 }
 0x19a   :  { %2202 = vmatmul.msk.f32.vlgmr.msrb.gmra.mxu1 %vm214_vm1, %v2833_v13 }
 0x19b   :  { %2204 = vmatmul.msk.f32.vlgmr.msra.gmra.mxu2 %vm214_vm1, %v2835_v14 }
 0x19c   :  { %2209 = vmatpush.xpose.msk.msrb.mxu2 %vm214_vm1, %v396_v22 }
 0x19e   :  { %v344_v23 = vpop.permute.xlu1 %343 }
 0x19f   :  { %v370_v24 = vpop.permute.xlu0 %369  ;;  %2205 = vmatpush.xpose.msk.msra.mxu3 %vm214_vm1, %v344_v23 }
 0x1a0   :  { %2207 = vmatpush.xpose.msk.msra.mxu1 %vm214_vm1, %v370_v24 }
 0x1a2   :  { %2206 = vmatmul.msk.f32.vlgmr.msra.gmra.mxu3 %vm214_vm1, %v2841_v15 }
 0x1a3   :  { %2208 = vmatmul.msk.f32.vlgmr.msra.gmra.mxu1 %vm214_vm1, %v2831_v12  ;;  %2210 = vmatmul.msk.f32.vlgmr.msrb.gmra.mxu2 %vm214_vm1, %v2843_v16 }
 0x1b3   :  { %v262_v28 = vpop.f32.mrf.mxu3 }
 0x1b4   :  { %v236_v25 = vpop.f32.mrf.mxu1  ;;  %v422_v35 = vmul.f32 0.35355338, %v262_v28 }
 0x1b5   :  { %v421_v26 = vmul.f32 0.35355338, %v236_v25 }
 0x1b6   :  { %v432_v39 = vsel %vm214_vm1, %v422_v35, -inf }
 0x1b7   :  { %v429_v27 = vsel %vm214_vm1, %v421_v26, -inf }
 0x1b8   :  { %430 = vmax.xlane.f32.xlu2 %v429_v27 }
 0x1fd   :  { %v288_v29 = vpop.f32.mrf.mxu3 }
 0x1fe   :  { %v423_v30 = vmul.f32 0.35355338, %v288_v29 }
 0x200   :  { %v435_v31 = vsel %vm214_vm1, %v423_v30, -inf }
 0x201   :  { %436 = vmax.xlane.f32.xlu0 %v435_v31 }
 0x217   :  { %v314_v32 = vpop.f32.mrf.mxu1 }
 0x218   :  { %v424_v33 = vmul.f32 0.35355338, %v314_v32 }
 0x21a   :  { %v438_v34 = vsel %vm214_vm1, %v424_v33, -inf }
 0x21b   :  { %439 = vmax.xlane.f32.xlu2 %v438_v34 }
 0x21e   :  { %v340_v36 = vpop.f32.mrf.mxu2 }
 0x21f   :  { %v425_v37 = vmul.f32 0.35355338, %v340_v36 }
 0x220   :  { %v392_v51 = vpop.f32.mrf.mxu1 }
 0x221   :  { %v441_v38 = vsel %vm214_vm1, %v425_v37, -inf  ;;  %v427_v52 = vmul.f32 0.35355338, %v392_v51 }
 0x222   :  { %442 = vmax.xlane.f32.xlu1 %v441_v38 }
 0x223   :  { %433 = vmax.xlane.f32.xlu2 %v432_v39  ;;  %v447_v53 = vsel %vm214_vm1, %v427_v52, -inf }
 0x225   :  { %v366_v40 = vpop.f32.mrf.mxu3 }
 0x226   :  { %v426_v41 = vmul.f32 0.35355338, %v366_v40  ;;  %v418_v42 = vpop.f32.mrf.mxu2 }
 0x227   :  { %v428_v43 = vmul.f32 0.35355338, %v418_v42 }
 0x228   :  { %v444_v45 = vsel %vm214_vm1, %v426_v41, -inf }
 0x229   :  { %v450_v44 = vsel %vm214_vm1, %v428_v43, -inf }
 0x22a   :  { %451 = vmax.xlane.f32.xlu1 %v450_v44 }
 0x22b   :  { %v431_v46 = vpop.xlane.xlu2 %430  ;;  %445 = vmax.xlane.f32.xlu2 %v444_v45 }
 0x22c   :  { %v453_v47 = vsub.f32 %v421_v26, %v431_v46 }
 0x22e   :  { %v461_v48 = vmul.f32 1.442695, %v453_v47 }
 0x230   :  { %2352 = vpow2.f32 %v461_v48 }
 0x236   :  { %v2882_v49 = vpop.eup %2352 }
 0x237   :  { %v477_v50 = vsel %vm214_vm1, %v2882_v49, 0.0 }
 0x238   :  { %478 = vadd.xlane.f32.xlu0 %v477_v50 }
 0x240   :  { %448 = vmax.xlane.f32.xlu0 %v447_v53 }
 0x243   :  { %2305 = vrot.lane.b32.xlu1 %v2304_v54, %s2655_s26 }
 0x254   :  { %2310 = vrot.lane.b32.xlu0 %v2309_v55, %s2655_s26 }
 0x274   :  { %v437_v60 = vpop.xlane.xlu0 %436 }
 0x275   :  { %v455_v2 = vsub.f32 %v423_v30, %v437_v60 }
 0x277   :  { %v465_v7 = vmul.f32 1.442695, %v455_v2 }
 0x28e   :  { %v440_v56 = vpop.xlane.xlu2 %439 }
 0x28f   :  { %v456_v57 = vsub.f32 %v424_v33, %v440_v56 }
 0x291   :  { %v467_v58 = vmul.f32 1.442695, %v456_v57 }
 0x293   :  { %2354 = vpow2.f32 %v467_v58 }
 0x295   :  { %v443_v59 = vpop.xlane.xlu1 %442 }
 0x296   :  { %v457_v61 = vsub.f32 %v425_v37, %v443_v59  ;;  %v434_v62 = vpop.xlane.xlu2 %433 }
 0x297   :  { %v454_v63 = vsub.f32 %v422_v35, %v434_v62 }
 0x298   :  { %v469_v0 = vmul.f32 1.442695, %v457_v61 }
 0x299   :  { %v2893_v1 = vpop.eup %2354  ;;  %v463_v3 = vmul.f32 1.442695, %v454_v63 }
 0x29a   :  { %2356 = vpow2.f32 %v469_v0  ;;  %v486_v6 = vsel %vm214_vm1, %v2893_v1, 0.0 }
 0x29b   :  { %2358 = vpow2.f32 %v463_v3  ;;  %487 = vadd.xlane.f32.xlu0 %v486_v6 }
 0x29c   :  { %2360 = vpow2.f32 %v465_v7 }
 0x29d   :  { %v452_v8 = vpop.xlane.xlu1 %451 }
 0x29e   :  { %v460_v9 = vsub.f32 %v428_v43, %v452_v8  ;;  %v446_v11 = vpop.xlane.xlu2 %445 }
 0x29f   :  { %v458_v13 = vsub.f32 %v426_v41, %v446_v11 }
 0x2a0   :  { %v2897_v14 = vpop.eup %2356  ;;  %v475_v17 = vmul.f32 1.442695, %v460_v9 }
 0x2a1   :  { %v2899_v18 = vpop.eup %2358  ;;  %v471_v19 = vmul.f32 1.442695, %v458_v13  ;;  %v489_v20 = vsel %vm214_vm1, %v2897_v14, 0.0 }
 0x2a2   :  { %2362 = vpow2.f32 %v475_v17  ;;  %490 = vadd.xlane.f32.xlu2 %v489_v20  ;;  %v480_v21 = vsel %vm214_vm1, %v2899_v18, 0.0  ;;  %v2905_v22 = vpop.eup %2360 }
 0x2a3   :  { %2364 = vpow2.f32 %v471_v19  ;;  %481 = vadd.xlane.f32.xlu1 %v480_v21  ;;  %v483_v27 = vsel %vm214_vm1, %v2905_v22, 0.0 }
 0x2a8   :  { %v2907_v23 = vpop.eup %2362 }
 0x2a9   :  { %v2909_v24 = vpop.eup %2364  ;;  %v498_v25 = vsel %vm214_vm1, %v2907_v23, 0.0 }
 0x2aa   :  { %499 = vadd.xlane.f32.xlu0 %v498_v25  ;;  %v492_v26 = vsel %vm214_vm1, %v2909_v24, 0.0 }
 0x2ab   :  { %493 = vadd.xlane.f32.xlu2 %v492_v26  ;;  %484 = vadd.xlane.f32.xlu1 %v483_v27  ;;  %v479_v28 = vpop.xlane.xlu0 %478 }
 0x2ac   :  { %2366 = vrcp.f32 %v479_v28  ;;  %v512_v35 = vand.u32 2147483648, %v479_v28  ;;  %v510_v40 = vand.u32 2147483647, %v479_v28  ;;  %vm506_vm3 = vweird.f32 %v479_v28 }
 0x2ae   :  { %v513_v42 = vor.u32 1.1754944e-38, %v512_v35  ;;  %vm511_vm5 = vcmp.eq.f32.partialorder %v510_v40, 8.507059e+37 }
 0x2b2   :  { %v2367_v29 = vpop.eup %2366 }
 0x2b3   :  { %v502_v30 = vmul.f32 %v2367_v29, %v479_v28  ;;  %v449_v31 = vpop.xlane.xlu0 %448  ;;  %vm507_vm2 = vweird.f32 %v2367_v29 }
 0x2b4   :  { %v459_v32 = vsub.f32 %v427_v52, %v449_v31  ;;  %vm508_vm4 = vmor %vm506_vm3, %vm507_vm2 }
 0x2b5   :  { %v503_v33 = vsub.f32 1.0, %v502_v30  ;;  %v2306_v34 = vpop.permute.xlu1 %2305 }
 0x2b6   :  { %v473_v36 = vmul.f32 1.442695, %v459_v32  ;;  %v2308_v37 = vunpack.i.h.bf16 %v2306_v34  ;;  %v2307_v38 = vunpack.i.l.bf16 %v2306_v34 }
 0x2b7   :  { %v504_v39 = vmul.f32 %v2367_v29, %v503_v33 }
 0x2b8   :  { %2368 = vpow2.f32 %v473_v36  ;;  %682 = vmatpush.msrb.mxu3 %v2307_v38  ;;  %732 = vmatpush.msrb.mxu1 %v2308_v37 }
 0x2b9   :  { %v505_v41 = vadd.f32 %v2367_v29, %v504_v39 }
 0x2bb   :  { %v509_v43 = vsel %vm508_vm4, %v2367_v29, %v505_v41 }
 0x2bc   :  { %v514_v44 = vsel %vm511_vm5, %v513_v42, %v509_v43 }
 0x2bd   :  { %v2918_v45 = vmul.f32 %v2882_v49, %v514_v44  ;;  %v2314_v49 = vpack.i.bf16 %v2831_v12, %v2813_v10 }
 0x2be   :  { %v2920_v46 = vpop.eup %2368  ;;  %787 = vrot.lane.b32.xlu0 %v2841_v15, %s2655_s26 }
 0x2bf   :  { %2211 = vmatmul.msk.f32.vlgmr.msrb.gmra.mxu3 %vm214_vm1, %v2918_v45  ;;  %v495_v47 = vsel %vm214_vm1, %v2920_v46, 0.0 }
 0x2c0   :  { %496 = vadd.xlane.f32.xlu2 %v495_v47 }
 0x2c4   :  { %837 = vrot.lane.b32.xlu1 %v2843_v16, %s2655_s26 }
 0x2c6   :  { %v2311_v48 = vpop.permute.xlu0 %2310 }
 0x2c7   :  { %v2313_v50 = vunpack.i.h.bf16 %v2311_v48  ;;  %v2312_v51 = vunpack.i.l.bf16 %v2311_v48 }
 0x2c9   :  { %757 = vmatpush.msra.mxu2 %v2313_v50  ;;  %782 = vmatpush.msra.mxu3 %v2312_v51 }
 0x2d8   :  { %2315 = vrot.lane.b32.xlu2 %v2314_v49, %s2655_s26 }
 0x30e   :  { %v488_v15 = vpop.xlane.xlu0 %487 }
 0x30f   :  { %2370 = vrcp.f32 %v488_v15  ;;  %v554_v57 = vand.u32 2147483648, %v488_v15  ;;  %vm548_vm7 = vweird.f32 %v488_v15  ;;  %v552_v60 = vand.u32 2147483647, %v488_v15 }
 0x311   :  { %v555_v62 = vor.u32 1.1754944e-38, %v554_v57  ;;  %vm553_vm9 = vcmp.eq.f32.partialorder %v552_v60, 8.507059e+37 }
 0x315   :  { %v2371_v52 = vpop.eup %2370  ;;  %v491_v53 = vpop.xlane.xlu2 %490 }
 0x316   :  { %v544_v54 = vmul.f32 %v2371_v52, %v488_v15  ;;  %2372 = vrcp.f32 %v491_v53  ;;  %v2933_v55 = vpop.xlane.xlu1 %481  ;;  %vm549_vm6 = vweird.f32 %v2371_v52  ;;  %v568_v2 = vand.u32 2147483648, %v491_v53 }
 0x317   :  { %vm550_vm8 = vmor %vm548_vm7, %vm549_vm6  ;;  %2374 = vrcp.f32 %v2933_v55  ;;  %v566_v7 = vand.u32 2147483647, %v491_v53  ;;  %vm562_vm11 = vweird.f32 %v491_v53 }
 0x318   :  { %v545_v56 = vsub.f32 1.0, %v544_v54  ;;  %v569_v17 = vor.u32 1.1754944e-38, %v568_v2  ;;  %v524_v54 = vand.u32 2147483647, %v2933_v55 }
 0x319   :  { %vm567_vm13 = vcmp.eq.f32.partialorder %v566_v7, 8.507059e+37 }
 0x31a   :  { %v546_v16 = vmul.f32 %v2371_v52, %v545_v56 }
 0x31c   :  { %v2373_v58 = vpop.eup %2372  ;;  %v547_v59 = vadd.f32 %v2371_v52, %v546_v16 }
 0x31d   :  { %v558_v10 = vmul.f32 %v2373_v58, %v491_v53  ;;  %v500_v12 = vpop.xlane.xlu0 %499  ;;  %vm563_vm10 = vweird.f32 %v2373_v58  ;;  %v2936_v8 = vpop.eup %2374  ;;  %v526_v53 = vand.u32 2147483648, %v2933_v55 }
 0x31e   :  { %v551_v61 = vsel %vm550_vm8, %v2371_v52, %v547_v59  ;;  %2376 = vrcp.f32 %v500_v12  ;;  %v485_v0 = vpop.xlane.xlu1 %484  ;;  %v2938_v11 = vpop.xlane.xlu2 %493  ;;  %vm564_vm12 = vmor %vm562_vm11, %vm563_vm10  ;;  %v516_v26 = vmul.f32 %v2936_v8, %v2933_v55  ;;  %v610_v36 = vand.u32 2147483648, %v500_v12 }
 0x31f   :  { %v559_v63 = vsub.f32 1.0, %v558_v10  ;;  %v556_v3 = vsel %vm553_vm9, %v555_v62, %v551_v61  ;;  %2378 = vrcp.f32 %v485_v0  ;;  %v540_v35 = vand.u32 2147483648, %v485_v0 }
 0x320   :  { %v2941_v19 = vmul.f32 %v2893_v1, %v556_v3  ;;  %2380 = vrcp.f32 %v2938_v11  ;;  %v517_v31 = vsub.f32 1.0, %v516_v26  ;;  %v538_v38 = vand.u32 2147483647, %v485_v0 }
 0x321   :  { %v560_v6 = vmul.f32 %v2373_v58, %v559_v63  ;;  %vm604_vm2 = vweird.f32 %v500_v12  ;;  %vm534_vm4 = vweird.f32 %v485_v0  ;;  %v541_v43 = vor.u32 1.1754944e-38, %v540_v35  ;;  %v894_v35 = vld [vmem:[%s3464_s3 + $0x10] sm:$0xff] }
 0x322   :  { %2214 = vmatmul.msk.f32.vlgmr.msra.gmra.mxu2 %vm214_vm1, %v2941_v19  ;;  %v518_v39 = vmul.f32 %v2936_v8, %v517_v31  ;;  %v611_v44 = vor.u32 1.1754944e-38, %v610_v36  ;;  %vm539_vm6 = vcmp.eq.f32.partialorder %v538_v38, 8.507059e+37  ;;  %vm521_vm7 = vweird.f32 %v2936_v8  ;;  %v893_v36 = vld [vmem:[%s3464_s3 + $0x8] sm:$0xff] }
 0x323   :  { %v561_v9 = vadd.f32 %v2373_v58, %v560_v6  ;;  %vm520_vm9 = vweird.f32 %v2933_v55  ;;  %vm525_vm11 = vcmp.eq.f32.partialorder %v524_v54, 8.507059e+37  ;;  %v580_v63 = vand.u32 2147483647, %v2938_v11 }
 0x324   :  { %v2377_v13 = vpop.eup %2376  ;;  %v519_v50 = vadd.f32 %v2936_v8, %v518_v39  ;;  %vm522_vm10 = vmor %vm520_vm9, %vm521_vm7  ;;  %vm652_vm7 = vcmask 195584  }
 0x325   :  { %v565_v20 = vsel %vm564_vm12, %v2373_v58, %v561_v9  ;;  %v600_v21 = vmul.f32 %v2377_v13, %v500_v12  ;;  %v2379_v29 = vpop.eup %2378  ;;  %vm605_vm14 = vweird.f32 %v2377_v13  ;;  %v527_v58 = vor.u32 1.1754944e-38, %v526_v53 }
 0x326   :  { %v570_v25 = vsel %vm567_vm13, %v569_v17, %v565_v20  ;;  %v530_v1 = vmul.f32 %v2379_v29, %v485_v0  ;;  %v2953_v33 = vpop.eup %2380  ;;  %vm535_vm15 = vweird.f32 %v2379_v29  ;;  %vm606_vm3 = vmor %vm604_vm2, %vm605_vm14  ;;  %vm576_vm13 = vweird.f32 %v2938_v11 }
 0x327   :  { %v601_v27 = vsub.f32 1.0, %v600_v21  ;;  %v2949_v28 = vmul.f32 %v2897_v14, %v570_v25  ;;  %v608_v14 = vand.u32 2147483647, %v500_v12  ;;  %v572_v40 = vmul.f32 %v2953_v33, %v2938_v11  ;;  %vm536_vm5 = vmor %vm534_vm4, %vm535_vm15 }
 0x328   :  { %v531_v32 = vsub.f32 1.0, %v530_v1  ;;  %vm577_vm12 = vweird.f32 %v2953_v33  ;;  %vm581_vm2 = vcmp.eq.f32.partialorder %v580_v63, 8.507059e+37 }
 0x329   :  { %v602_v30 = vmul.f32 %v2377_v13, %v601_v27  ;;  %2215 = vmatmul.msk.f32.vlgmr.msra.gmra.mxu3 %vm214_vm1, %v2949_v28  ;;  %vm609_vm8 = vcmp.eq.f32.partialorder %v608_v14, 8.507059e+37  ;;  %v573_v49 = vsub.f32 1.0, %v572_v40  ;;  %vm2983_vm14 = vmor %vm576_vm13, %vm577_vm12 }
 0x32a   :  { %v532_v37 = vmul.f32 %v2379_v29, %v531_v32 }
 0x32b   :  { %v603_v34 = vadd.f32 %v2377_v13, %v602_v30  ;;  %v574_v57 = vmul.f32 %v2953_v33, %v573_v49  ;;  %v2335_v49 = vld [vmem:[#allocation5] ss:$0 sm:$0xff] }
 0x32c   :  { %v533_v41 = vadd.f32 %v2379_v29, %v532_v37  ;;  %v892_v37 = vld [vmem:[%s3464_s3] sm:$0xff] }
 0x32d   :  { %v607_v42 = vsel %vm606_vm3, %v2377_v13, %v603_v34  ;;  %v575_v60 = vadd.f32 %v2953_v33, %v574_v57  ;;  %v895_v34 = vld [vmem:[%s3464_s3 + $0x18] sm:$0xff] }
 0x32e   :  { %v537_v47 = vsel %vm536_vm5, %v2379_v29, %v533_v41  ;;  %v612_v51 = vsel %vm609_vm8, %v611_v44, %v607_v42  ;;  %918 = vmatpush.msrb.mxu3 %v895_v34 }
 0x32f   :  { %v542_v48 = vsel %vm539_vm6, %v541_v43, %v537_v47  ;;  %v2969_v16 = vmul.f32 %v2907_v23, %v612_v51  ;;  %v582_v23 = vand.u32 2147483648, %v2938_v11  ;;  %v579_v7 = vsel %vm2983_vm14, %v2953_v33, %v575_v60 }
 0x330   :  { %v2961_v15 = vmul.f32 %v2905_v22, %v542_v48  ;;  %v523_v22 = vsel %vm522_vm10, %v2936_v8, %v519_v50  ;;  %v788_v8 = vpop.permute.xlu0 %787  ;;  %919 = vmatpush.msrb.mxu3 %v894_v35  ;;  %vm650_vm6 = vcmask 130048  }
 0x331   :  { %v528_v55 = vsel %vm525_vm11, %v527_v58, %v523_v22 }
 0x332   :  { %2213 = vmatmul.msk.f32.vlgmr.msrb.gmra.mxu1 %vm214_vm1, %v2961_v15  ;;  %v2981_v2 = vmul.f32 %v2899_v18, %v528_v55  ;;  %v583_v18 = vor.u32 1.1754944e-38, %v582_v23  ;;  %920 = vmatpush.msrb.mxu3 %v893_v36  ;;  %v2657_v55 = vmov 32.0  }
 0x333   :  { %v497_v52 = vpop.xlane.xlu2 %496 }
 0x334   :  { %2382 = vrcp.f32 %v497_v52  ;;  %v596_v6 = vand.u32 2147483648, %v497_v52  ;;  %v594_v13 = vand.u32 2147483647, %v497_v52  ;;  %vm590_vm3 = vweird.f32 %v497_v52  ;;  %921 = vmatpush.msrb.mxu3 %v892_v37  ;;  %v1037_v37 = vld [vmem:[%s3470_s9 + $0x20] sm:$0xff] }
 0x335   :  { %v584_v17 = vsel %vm581_vm2, %v583_v18, %v579_v7  ;;  %2384 = vrcp.f32 %v2657_v55  ;;  %v997_v18 = vld [vmem:[%s3468_s7 + $0x18] sm:$0xff]  ;;  %v1033_v55 = vld [vmem:[%s3470_s9] sm:$0xff] }
 0x336   :  { %v838_v56 = vpop.permute.xlu1 %837  ;;  %v597_v20 = vor.u32 1.1754944e-38, %v596_v6  ;;  %vm595_vm5 = vcmp.eq.f32.partialorder %v594_v13, 8.507059e+37  ;;  %v2993_v26 = vmul.f32 %v2909_v24, %v584_v17  ;;  %v995_v17 = vld [vmem:[%s3468_s7 + $0x8] sm:$0xff] }
 0x337   :  { %857 = vmatpush.msrb.mxu2 %v838_v56 }
 0x338   :  { %2218 = vmatmul.msk.f32.vlgmr.msrb.gmra.mxu2 %vm214_vm1, %v2969_v16 }
 0x33a   :  { %v2383_v59 = vpop.eup %2382 }
 0x33b   :  { %v586_v10 = vmul.f32 %v2383_v59, %v497_v52  ;;  %v2316_v12 = vpop.permute.xlu2 %2315  ;;  %vm591_vm15 = vweird.f32 %v2383_v59  ;;  %v2385_v60 = vpop.eup %2384 }
 0x33c   :  { %v2318_v61 = vunpack.i.h.bf16 %v2316_v12  ;;  %v2317_v62 = vunpack.i.l.bf16 %v2316_v12  ;;  %vm592_vm4 = vmor %vm590_vm3, %vm591_vm15  ;;  %vm944_vm8 = vweird.f32 %v2385_v60  ;;  %vm1045_vm15 = vcmask 523264  }
 0x33d   :  { %v587_v0 = vsub.f32 1.0, %v586_v10  ;;  %v940_v10 = vmul.f32 32.0, %v2385_v60 }
 0x33e   :  { %707 = vmatpush.msrb.mxu0 %v2317_v62  ;;  %832 = vmatpush.msra.mxu1 %v2318_v61 }
 0x33f   :  { %v588_v9 = vmul.f32 %v2383_v59, %v587_v0  ;;  %2212 = vmatmul.msk.f32.vlgmr.msrb.gmra.mxu0 %vm214_vm1, %v2981_v2  ;;  %v941_v12 = vsub.f32 1.0, %v940_v10 }
 0x340   :  { %807 = vmatpush.msra.mxu0 %v788_v8 }
 0x341   :  { %v589_v11 = vadd.f32 %v2383_v59, %v588_v9  ;;  %v942_v23 = vmul.f32 %v2385_v60, %v941_v12 }
 0x342   :  { %v684_v29 = vpop.f32.mrf.mxu3  ;;  %1020 = vmatpush.msrb.mxu0 %v997_v18 }
 0x343   :  { %v593_v21 = vsel %vm592_vm4, %v2383_v59, %v589_v11  ;;  %v943_v61 = vadd.f32 %v2385_v60, %v942_v23  ;;  %v996_v11 = vld [vmem:[%s3468_s7 + $0x10] sm:$0xff] }
 0x344   :  { %v598_v25 = vsel %vm595_vm5, %v597_v20, %v593_v21  ;;  %1021 = vmatpush.msrb.mxu0 %v996_v11  ;;  %v994_v20 = vld [vmem:[%s3468_s7] sm:$0xff] }
 0x345   :  { %v2996_v27 = vmul.f32 %v2920_v46, %v598_v25  ;;  %v3032_v62 = vsel %vm944_vm8, %v2385_v60, %v943_v61  ;;  %v2338_v60 = vld [vmem:[#allocation8] ss:$0 sm:$0xff] }
 0x346   :  { %1022 = vmatpush.msrb.mxu0 %v995_v17 }
 0x347   :  { %2216 = vmatmul.msk.f32.vlgmr.msra.gmra.mxu0 %vm214_vm1, %v2993_v26  ;;  %2217 = vmatmul.msk.f32.vlgmr.msra.gmra.mxu1 %vm214_vm1, %v2996_v27 }
 0x348   :  { %1023 = vmatpush.msrb.mxu0 %v994_v20 }
 0x3a5   :  { %v759_v31 = vpop.f32.mrf.mxu2 }
 0x3ac   :  { %v784_v30 = vpop.f32.mrf.mxu3 }
 0x3ad   :  { %872 = vrot.lane.b32.xlu0 %v784_v30, %s2641_s29 }
 0x3af   :  { %v734_v1 = vpop.f32.mrf.mxu1 }
 0x3b0   :  { %864 = vrot.lane.b32.xlu1 %v734_v1, %s2647_s13 }
 0x3b8   :  { %866 = vrot.lane.b32.xlu1 %v759_v31, %s2647_s13 }
 0x3bb   :  { %v859_v33 = vpop.f32.mrf.mxu2 }
 0x3bc   :  { %v709_v24 = vpop.f32.mrf.mxu0 }
 0x3c4   :  { %v809_v32 = vpop.f32.mrf.mxu0  ;;  %v834_v46 = vpop.f32.mrf.mxu1 }
 0x3c5   :  { %880 = vrot.lane.b32.xlu2 %v834_v46, %s2656_s23  ;;  %874 = vrot.lane.b32.xlu0 %v809_v32, %s2641_s29  ;;  %v1039_v32 = vld [vmem:[%s3470_s9 + $0x30] sm:$0xff] }
 0x3cd   :  { %882 = vrot.lane.b32.xlu2 %v859_v33, %s2656_s23  ;;  %v1038_v33 = vld [vmem:[%s3470_s9 + $0x28] sm:$0xff] }
 0x41f   :  { %v873_v14 = vpop.permute.xlu0 %872  ;;  %v881_v40 = vpop.permute.xlu2 %880 }
 0x422   :  { %v865_v38 = vpop.permute.xlu1 %864 }
 0x423   :  { %v886_v39 = vsel %vm214_vm1, %v684_v29, %v865_v38 }
 0x424   :  { %v888_v41 = vsel %vm650_vm6, %v886_v39, %v873_v14  ;;  %v1036_v39 = vld [vmem:[%s3470_s9 + $0x18] sm:$0xff] }
 0x425   :  { %v890_v42 = vsel %vm652_vm7, %v888_v41, %v881_v40  ;;  %v2336_v40 = vld [vmem:[%s3466_s5] ss:$0 sm:$0xff] }
 0x426   :  { %2219 = vmatmul.msk.f32.vlgmr.msrb.gmra.mxu3 %vm168_vm0, %v890_v42 }
 0x427   :  { %v883_v48 = vpop.permute.xlu2 %882 }
 0x42a   :  { %v867_v43 = vpop.permute.xlu1 %866 }
 0x42b   :  { %v887_v44 = vsel %vm214_vm1, %v709_v24, %v867_v43  ;;  %v1040_v24 = vld [vmem:[%s3470_s9 + $0x38] sm:$0xff]  ;;  %v2337_v43 = vld [vmem:[#allocation7] ss:$0 sm:$0xff] }
 0x42c   :  { %1060 = vmatpush.msrb.mxu1 %v1040_v24 }
 0x42e   :  { %1061 = vmatpush.msrb.mxu1 %v1039_v32  ;;  %v2228_v32 = vld [vmem:[%s3462_s1 + $0x38] sm:$0xff] }
 0x42f   :  { %1161 = vmatpush.msra.mxu2 %v2228_v32 }
 0x430   :  { %1062 = vmatpush.msrb.mxu1 %v1038_v33  ;;  %v2226_v33 = vld [vmem:[%s3462_s1 + $0x28] sm:$0xff] }
 0x432   :  { %1063 = vmatpush.msrb.mxu1 %v1037_v37 }
 0x434   :  { %1064 = vmatpush.msrb.mxu1 %v1036_v39 }
 0x437   :  { %v875_v47 = vpop.permute.xlu0 %874 }
 0x438   :  { %v889_v50 = vsel %vm650_vm6, %v887_v44, %v875_v47 }
 0x439   :  { %v891_v51 = vsel %vm652_vm7, %v889_v50, %v883_v48 }
 0x43a   :  { %2220 = vmatmul.msk.f32.gmra.mxu3 %vm168_vm0, %v891_v51 }
 0x4a9   :  { %v923_v52 = vpop.f32.mrf.mxu3 }
 0x4aa   :  { %v924_v53 = vadd.f32 %v2335_v49, %v923_v52 }
 0x4ac   :  { %v929_v54 = vadd.f32 %v924_v53, %v2796_v4 }
 0x4ae   :  { %v933_v56 = vsel %vm168_vm0, %v929_v54, 0.0 }
 0x4af   :  { %934 = vadd.xlane.f32.xlu1 %v933_v56 }
 0x4bd   :  { %v926_v57 = vpop.f32.mrf.mxu3 }
 0x4be   :  { %v927_v22 = vadd.f32 %v2335_v49, %v926_v57 }
 0x4c0   :  { %v930_v58 = vadd.f32 %v927_v22, %v2800_v5 }
 0x4c2   :  { %v936_v59 = vsel %vm168_vm0, %v930_v58, 0.0 }
 0x4c3   :  { %937 = vadd.xlane.f32.xlu0 %v936_v59  ;;  %v1034_v59 = vld [vmem:[%s3470_s9 + $0x8] sm:$0xff] }
 0x522   :  { %v935_v4 = vpop.xlane.xlu1 %934 }
 0x523   :  { %v946_v63 = vmul.f32 %v3032_v62, %v935_v4 }
 0x525   :  { %v948_v0 = vsub.f32 %v929_v54, %v946_v63 }
 0x527   :  { %v950_v3 = vmul.f32 %v948_v0, %v948_v0 }
 0x529   :  { %v952_v5 = vsel %vm168_vm0, %v950_v3, 0.0 }
 0x52a   :  { %953 = vadd.xlane.f32.xlu2 %v952_v5 }
 0x536   :  { %v938_v6 = vpop.xlane.xlu0 %937 }
 0x537   :  { %v947_v7 = vmul.f32 %v3032_v62, %v938_v6 }
 0x539   :  { %v949_v8 = vsub.f32 %v930_v58, %v947_v7  ;;  %v1035_v58 = vld [vmem:[%s3470_s9 + $0x10] sm:$0xff] }
 0x53a   :  { %1065 = vmatpush.msrb.mxu1 %v1035_v58 }
 0x53b   :  { %v951_v9 = vmul.f32 %v949_v8, %v949_v8 }
 0x53c   :  { %1066 = vmatpush.msrb.mxu1 %v1034_v59 }
 0x53d   :  { %v955_v13 = vsel %vm168_vm0, %v951_v9, 0.0 }
 0x53e   :  { %956 = vadd.xlane.f32.xlu1 %v955_v13  ;;  %1067 = vmatpush.msrb.mxu1 %v1033_v55 }
 0x59d   :  { %v954_v21 = vpop.xlane.xlu2 %953 }
 0x59e   :  { %v958_v25 = vmul.f32 %v954_v21, %v3032_v62 }
 0x5a0   :  { %v960_v29 = vadd.f32 1e-05, %v958_v25 }
 0x5a2   :  { %2386 = vrsqrt.f32 %v960_v29  ;;  %vm968_vm10 = vweird.f32 %v960_v29 }
 0x5a8   :  { %v2387_v30 = vpop.eup %2386 }
 0x5a9   :  { %v963_v1 = vmul.f32 %v2387_v30, %v960_v29  ;;  %vm969_vm9 = vweird.f32 %v2387_v30 }
 0x5aa   :  { %vm970_vm11 = vmor %vm968_vm10, %vm969_vm9 }
 0x5ab   :  { %v964_v31 = vmul.f32 %v2387_v30, %v963_v1 }
 0x5ad   :  { %v965_v46 = vmul.f32 0.5, %v964_v31 }
 0x5af   :  { %v966_v35 = vsub.f32 1.5, %v965_v46  ;;  %v2227_v46 = vld [vmem:[%s3462_s1 + $0x30] sm:$0xff] }
 0x5b0   :  { %1162 = vmatpush.msra.mxu2 %v2227_v46 }
 0x5b1   :  { %v957_v34 = vpop.xlane.xlu1 %956  ;;  %v967_v38 = vmul.f32 %v2387_v30, %v966_v35 }
 0x5b2   :  { %v959_v36 = vmul.f32 %v957_v34, %v3032_v62  ;;  %1163 = vmatpush.msra.mxu2 %v2226_v33  ;;  %v2225_v34 = vld [vmem:[%s3462_s1 + $0x20] sm:$0xff]  ;;  %s2660_s1 = smov 48  }
 0x5b3   :  { %v971_v41 = vsel %vm970_vm11, %v2387_v30, %v967_v38 }
 0x5b4   :  { %v961_v14 = vadd.f32 1e-05, %v959_v36  ;;  %v982_v42 = vmul.f32 %v971_v41, %v948_v0  ;;  %v2339_v0 = vld [vmem:[#allocation10] ss:$0 sm:$0xff]  ;;  %1164 = vmatpush.msra.mxu2 %v2225_v34 }
 0x5b6   :  { %2388 = vrsqrt.f32 %v961_v14  ;;  %v987_v44 = vmul.f32 %v2336_v40, %v982_v42  ;;  %vm978_vm13 = vweird.f32 %v961_v14 }
 0x5b8   :  { %v992_v47 = vadd.f32 %v2337_v43, %v987_v44 }
 0x5ba   :  { %2221 = vmatmul.msk.f32.vlgmr.msrb.gmra.mxu0 %vm168_vm0, %v992_v47 }
 0x5bc   :  { %v2389_v48 = vpop.eup %2388 }
 0x5bd   :  { %v973_v50 = vmul.f32 %v2389_v48, %v961_v14  ;;  %vm979_vm12 = vweird.f32 %v2389_v48 }
 0x5be   :  { %vm980_vm14 = vmor %vm978_vm13, %vm979_vm12 }
 0x5bf   :  { %v974_v51 = vmul.f32 %v2389_v48, %v973_v50 }
 0x5c1   :  { %v975_v49 = vmul.f32 0.5, %v974_v51 }
 0x5c3   :  { %v976_v52 = vsub.f32 1.5, %v975_v49  ;;  %v2341_v49 = vld [vmem:[%s3473_s12] ss:$0 sm:$0xff] }
 0x5c5   :  { %v977_v53 = vmul.f32 %v2389_v48, %v976_v52 }
 0x5c7   :  { %v981_v54 = vsel %vm980_vm14, %v2389_v48, %v977_v53  ;;  %v2340_v48 = vld [vmem:[%s3472_s11] ss:$0 sm:$0xff] }
 0x5c8   :  { %v983_v56 = vmul.f32 %v981_v54, %v949_v8 }
 0x5ca   :  { %v988_v57 = vmul.f32 %v2336_v40, %v983_v56 }
 0x5cc   :  { %v993_v22 = vadd.f32 %v2337_v43, %v988_v57 }
 0x5ce   :  { %2222 = vmatmul.msk.f32.gmra.mxu0 %vm168_vm0, %v993_v22 }
 0x637   :  { %v1025_v10 = vpop.f32.mrf.mxu0 }
 0x638   :  { %v1026_v12 = vadd.f32 %v2338_v60, %v1025_v10 }
 0x63a   :  { %v1031_v23 = vmax.f32 %v1026_v12, 0.0 }
 0x63c   :  { %2223 = vmatmul.msk.f32.vlgmr.msrb.gmra.mxu1 %vm1045_vm15, %v1031_v23  ;;  %v2342_v23 = vld [vmem:[%s3463_s2 + $0x1] ss:$0 sm:$0xff] }
 0x64b   :  { %v1028_v61 = vpop.f32.mrf.mxu0 }
 0x64c   :  { %v1029_v4 = vadd.f32 %v2338_v60, %v1028_v61 }
 0x64e   :  { %v1032_v63 = vmax.f32 %v1029_v4, 0.0 }
 0x650   :  { %2224 = vmatmul.msk.f32.gmra.mxu1 %vm1045_vm15, %v1032_v63 }
 0x6b9   :  { %v1069_v3 = vpop.f32.mrf.mxu1 }
 0x6ba   :  { %v1070_v5 = vadd.f32 %v2339_v0, %v1069_v3 }
 0x6bc   :  { %v1075_v6 = vadd.f32 %v1070_v5, %v992_v47 }
 0x6be   :  { %v1079_v7 = vsel %vm168_vm0, %v1075_v6, 0.0 }
 0x6bf   :  { %1080 = vadd.xlane.f32.xlu0 %v1079_v7 }
 0x6cd   :  { %v1072_v8 = vpop.f32.mrf.mxu1 }
 0x6ce   :  { %v1073_v9 = vadd.f32 %v2339_v0, %v1072_v8 }
 0x6d0   :  { %v1076_v13 = vadd.f32 %v1073_v9, %v993_v22 }
 0x6d2   :  { %v1082_v18 = vsel %vm168_vm0, %v1076_v13, 0.0 }
 0x6d3   :  { %1083 = vadd.xlane.f32.xlu2 %v1082_v18 }
 0x732   :  { %v1081_v11 = vpop.xlane.xlu0 %1080 }
 0x733   :  { %v1085_v17 = vmul.f32 %v1081_v11, %v3032_v62 }
 0x735   :  { %v1087_v20 = vsub.f32 %v1075_v6, %v1085_v17 }
 0x737   :  { %v1089_v21 = vmul.f32 %v1087_v20, %v1087_v20 }
 0x739   :  { %v1091_v25 = vsel %vm168_vm0, %v1089_v21, 0.0 }
 0x73a   :  { %1092 = vadd.xlane.f32.xlu1 %v1091_v25 }
 0x746   :  { %v1084_v29 = vpop.xlane.xlu2 %1083 }
 0x747   :  { %v1086_v30 = vmul.f32 %v1084_v29, %v3032_v62 }
 0x749   :  { %v1088_v1 = vsub.f32 %v1076_v13, %v1086_v30 }
 0x74b   :  { %v1090_v31 = vmul.f32 %v1088_v1, %v1088_v1 }
 0x74d   :  { %v1094_v24 = vsel %vm168_vm0, %v1090_v31, 0.0 }
 0x74e   :  { %1095 = vadd.xlane.f32.xlu0 %v1094_v24 }
 0x7ad   :  { %v1093_v35 = vpop.xlane.xlu1 %1092 }
 0x7ae   :  { %v1097_v36 = vmul.f32 %v1093_v35, %v3032_v62 }
 0x7b0   :  { %v1099_v37 = vadd.f32 1e-05, %v1097_v36 }
 0x7b2   :  { %2390 = vrsqrt.f32 %v1099_v37  ;;  %vm1107_vm3 = vweird.f32 %v1099_v37 }
 0x7b8   :  { %v2391_v38 = vpop.eup %2390 }
 0x7b9   :  { %v1102_v14 = vmul.f32 %v2391_v38, %v1099_v37  ;;  %vm1108_vm2 = vweird.f32 %v2391_v38 }
 0x7ba   :  { %vm1109_vm4 = vmor %vm1107_vm3, %vm1108_vm2 }
 0x7bb   :  { %v1103_v39 = vmul.f32 %v2391_v38, %v1102_v14 }
 0x7bd   :  { %v1104_v40 = vmul.f32 0.5, %v1103_v39 }
 0x7bf   :  { %v1105_v42 = vsub.f32 1.5, %v1104_v40 }
 0x7c1   :  { %v1096_v41 = vpop.xlane.xlu0 %1095  ;;  %v1106_v44 = vmul.f32 %v2391_v38, %v1105_v42 }
 0x7c2   :  { %v1098_v43 = vmul.f32 %v1096_v41, %v3032_v62 }
 0x7c3   :  { %v1110_v50 = vsel %vm1109_vm4, %v2391_v38, %v1106_v44 }
 0x7c4   :  { %v1100_v47 = vadd.f32 1e-05, %v1098_v43  ;;  %v1121_v51 = vmul.f32 %v1110_v50, %v1087_v20 }
 0x7c6   :  { %2392 = vrsqrt.f32 %v1100_v47  ;;  %v1126_v52 = vmul.f32 %v2340_v48, %v1121_v51  ;;  %vm1117_vm8 = vweird.f32 %v1100_v47 }
 0x7c8   :  { %v3109_v53 = vadd.f32 %v2341_v49, %v1126_v52 }
 0x7ca   :  { %2230 = vmatmul.msk.f32.vlgmr.msra.gmra.mxu2 %vm168_vm0, %v3109_v53 }
 0x7cc   :  { %v2393_v54 = vpop.eup %2392 }
 0x7cd   :  { %v1112_v56 = vmul.f32 %v2393_v54, %v1100_v47  ;;  %vm1118_vm5 = vweird.f32 %v2393_v54 }
 0x7ce   :  { %vm1119_vm9 = vmor %vm1117_vm8, %vm1118_vm5 }
 0x7cf   :  { %v1113_v57 = vmul.f32 %v2393_v54, %v1112_v56 }
 0x7d1   :  { %v1114_v22 = vmul.f32 0.5, %v1113_v57 }
 0x7d3   :  { %v1115_v58 = vsub.f32 1.5, %v1114_v22 }
 0x7d5   :  { %v1116_v59 = vmul.f32 %v2393_v54, %v1115_v58 }
 0x7d7   :  { %v1120_v55 = vsel %vm1119_vm9, %v2393_v54, %v1116_v59 }
 0x7d8   :  { %v1122_v60 = vmul.f32 %v1120_v55, %v1088_v1 }
 0x7da   :  { %v1127_v10 = vmul.f32 %v2340_v48, %v1122_v60 }
 0x7dc   :  { %v3113_v12 = vadd.f32 %v2341_v49, %v1127_v10 }
 0x7de   :  { %2231 = vmatmul.msk.f32.gmra.mxu2 %vm168_vm0, %v3113_v12 }
 0x84d   :  { %v1166_v61 = vpop.f32.mrf.mxu2 }
 0x84e   :  { %v3120_v4 = vadd.f32 %v2342_v23, %v1166_v61 }
 0x850   :  { %1182 = vrot.lane.b32.xlu0 %v3120_v4, %s2651_s19  ;;  %1174 = vrot.lane.b32.xlu2 %v3120_v4, %s2652_s21 }
 0x858   :  { %1178 = vrot.lane.b32.xlu0 %v3120_v4, %s2653_s24 }
 0x861   :  { %v1169_v63 = vpop.f32.mrf.mxu2 }
 0x862   :  { %v3128_v0 = vadd.f32 %v2342_v23, %v1169_v63 }
 0x864   :  { %1184 = vrot.lane.b32.xlu2 %v3128_v0, %s2651_s19  ;;  %1176 = vrot.lane.b32.xlu1 %v3128_v0, %s2652_s21  ;;  %s2173_s21 = sshll.u32 %s3476_s15, 4  ;;  %s2174_s21 = int_to_ptr.hbm [resolvable:$true] %s2173_s21 }
 0x86c   :  { %1186 = vrot.lane.b32.xlu2 %v3120_v4, %s2654_s22  ;;  %1180 = vrot.lane.b32.xlu1 %v3128_v0, %s2653_s24 }
 0x8aa   :  { %v3138_v3 = vpop.permute.xlu2 %1174 }
 0x8ab   :  { %1238 = vrot.lane.b32.xlu0 %v3138_v3, %s2654_s22 }
 0x8b3   :  { %1212 = vrot.lane.b32.xlu0 %v3128_v0, %s2654_s22 }
 0x8be   :  { %v3144_v5 = vpop.permute.xlu2 %1184 }
 0x8c2   :  { %v3146_v6 = vpop.permute.xlu0 %1182 }
 0x8c3   :  { %1342 = vrot.lane.b32.xlu2 %v3146_v6, %s2654_s22 }
 0x8c6   :  { %v1187_v7 = vpop.permute.xlu2 %1186 }
 0x8c7   :  { %2232 = vmatpush.xpose.msk.msra.mxu3 %vm214_vm1, %v1187_v7 }
 0x8ca   :  { %2233 = vmatmul.msk.f32.vlgmr.msra.gmra.mxu3 %vm214_vm1, %v3120_v4  ;;  %v3153_v8 = vpop.permute.xlu0 %1178 }
 0x8cb   :  { %1290 = vrot.lane.b32.xlu2 %v3153_v8, %s2654_s22 }
 0x8d6   :  { %v3157_v9 = vpop.permute.xlu1 %1176 }
 0x8d7   :  { %1264 = vrot.lane.b32.xlu1 %v3157_v9, %s2654_s22  ;;  %v2324_v58 = vpack.i.bf16 %v3146_v6, %v3157_v9 }
 0x8de   :  { %v3161_v13 = vpop.permute.xlu1 %1180 }
 0x8df   :  { %1368 = vrot.lane.b32.xlu1 %v3144_v5, %s2654_s22  ;;  %1316 = vrot.lane.b32.xlu0 %v3161_v13, %s2654_s22 }
 0x91d   :  { %v1343_v18 = vpop.permute.xlu2 %1342  ;;  %v1239_v11 = vpop.permute.xlu0 %1238 }
 0x91e   :  { %2236 = vmatpush.xpose.msk.msrb.mxu2 %vm214_vm1, %v1239_v11 }
 0x921   :  { %2237 = vmatmul.msk.f32.vlgmr.msrb.gmra.mxu2 %vm214_vm1, %v3138_v3 }
 0x922   :  { %2244 = vmatpush.xpose.msk.msra.mxu2 %vm214_vm1, %v1343_v18 }
 0x925   :  { %v1291_v17 = vpop.permute.xlu2 %1290  ;;  %v1213_v20 = vpop.permute.xlu0 %1212 }
 0x926   :  { %2234 = vmatpush.xpose.msk.msra.mxu0 %vm214_vm1, %v1213_v20 }
 0x929   :  { %2235 = vmatmul.msk.f32.vlgmr.msra.gmra.mxu0 %vm214_vm1, %v3128_v0  ;;  %2245 = vmatmul.msk.f32.vlgmr.msra.gmra.mxu2 %vm214_vm1, %v3146_v6 }
 0x92a   :  { %2240 = vmatpush.xpose.msk.msrb.mxu0 %vm214_vm1, %v1291_v17 }
 0x931   :  { %2241 = vmatmul.msk.f32.vlgmr.msrb.gmra.mxu0 %vm214_vm1, %v3153_v8 }
 0x949   :  { %v1265_v21 = vpop.permute.xlu1 %1264 }
 0x94a   :  { %2238 = vmatpush.xpose.msk.msrb.mxu3 %vm214_vm1, %v1265_v21 }
 0x94d   :  { %v1209_v25 = vpop.f32.mrf.mxu3  ;;  %2239 = vmatmul.msk.f32.vlgmr.msrb.gmra.mxu3 %vm214_vm1, %v3157_v9 }
 0x94e   :  { %v1394_v29 = vmul.f32 0.35355338, %v1209_v25 }
 0x950   :  { %v1402_v30 = vsel %vm214_vm1, %v1394_v29, -inf }
 0x951   :  { %v1369_v1 = vpop.permute.xlu1 %1368  ;;  %1403 = vmax.xlane.f32.xlu2 %v1402_v30  ;;  %v1317_v31 = vpop.permute.xlu0 %1316 }
 0x952   :  { %2242 = vmatpush.xpose.msk.msra.mxu1 %vm214_vm1, %v1317_v31  ;;  %2246 = vmatpush.xpose.msk.msra.mxu3 %vm214_vm1, %v1369_v1 }
 0x955   :  { %2243 = vmatmul.msk.f32.vlgmr.msra.gmra.mxu1 %vm214_vm1, %v3161_v13  ;;  %2247 = vmatmul.msk.f32.vlgmr.msra.gmra.mxu3 %vm214_vm1, %v3144_v5 }
 0x9a4   :  { %v1261_v24 = vpop.f32.mrf.mxu2 }
 0x9a5   :  { %v1396_v32 = vmul.f32 0.35355338, %v1261_v24  ;;  %v2319_v24 = vpack.i.bf16 %v3120_v4, %v3138_v3 }
 0x9a6   :  { %v1235_v46 = vpop.f32.mrf.mxu0 }
 0x9a7   :  { %v1395_v33 = vmul.f32 0.35355338, %v1235_v46  ;;  %v1408_v34 = vsel %vm214_vm1, %v1396_v32, -inf }
 0x9a8   :  { %1409 = vmax.xlane.f32.xlu1 %v1408_v34 }
 0x9a9   :  { %v1405_v35 = vsel %vm214_vm1, %v1395_v33, -inf }
 0x9aa   :  { %1406 = vmax.xlane.f32.xlu2 %v1405_v35 }
 0x9ac   :  { %v1365_v36 = vpop.f32.mrf.mxu2 }
 0x9ad   :  { %v1400_v37 = vmul.f32 0.35355338, %v1365_v36 }
 0x9ae   :  { %v1313_v38 = vpop.f32.mrf.mxu0 }
 0x9af   :  { %v1398_v14 = vmul.f32 0.35355338, %v1313_v38  ;;  %v1420_v39 = vsel %vm214_vm1, %v1400_v37, -inf }
 0x9b0   :  { %1421 = vmax.xlane.f32.xlu1 %v1420_v39 }
 0x9b1   :  { %v1414_v40 = vsel %vm214_vm1, %v1398_v14, -inf }
 0x9b2   :  { %1415 = vmax.xlane.f32.xlu0 %v1414_v40 }
 0x9c4   :  { %v1404_v41 = vpop.xlane.xlu2 %1403 }
 0x9c5   :  { %v1426_v44 = vsub.f32 %v1394_v29, %v1404_v41 }
 0x9c7   :  { %v1434_v49 = vmul.f32 1.442695, %v1426_v44  ;;  %v2329_v44 = vpack.i.bf16 %v3153_v8, %v3128_v0 }
 0x9c9   :  { %2394 = vpow2.f32 %v1434_v49 }
 0x9cf   :  { %v3196_v57 = vpop.eup %2394 }
 0x9d0   :  { %v1287_v42 = vpop.f32.mrf.mxu3  ;;  %v1450_v22 = vsel %vm214_vm1, %v3196_v57, 0.0 }
 0x9d1   :  { %v1397_v43 = vmul.f32 0.35355338, %v1287_v42 }
 0x9d2   :  { %v1339_v47 = vpop.f32.mrf.mxu1 }
 0x9d3   :  { %v1399_v48 = vmul.f32 0.35355338, %v1339_v47  ;;  %v1411_v50 = vsel %vm214_vm1, %v1397_v43, -inf }
 0x9d4   :  { %1412 = vmax.xlane.f32.xlu0 %v1411_v50 }
 0x9d5   :  { %v1417_v51 = vsel %vm214_vm1, %v1399_v48, -inf }
 0x9d6   :  { %1418 = vmax.xlane.f32.xlu2 %v1417_v51 }
 0x9d8   :  { %v1391_v52 = vpop.f32.mrf.mxu3 }
 0x9d9   :  { %v1401_v54 = vmul.f32 0.35355338, %v1391_v52 }
 0x9db   :  { %v1423_v56 = vsel %vm214_vm1, %v1401_v54, -inf }
 0x9dc   :  { %1424 = vmax.xlane.f32.xlu1 %v1423_v56 }
 0x9e4   :  { %1451 = vadd.xlane.f32.xlu1 %v1450_v22 }
 0x9e8   :  { %2325 = vrot.lane.b32.xlu0 %v2324_v58, %s2655_s26 }
 0xa1b   :  { %v1410_v59 = vpop.xlane.xlu1 %1409 }
 0xa1c   :  { %v1428_v55 = vsub.f32 %v1396_v32, %v1410_v59 }
 0xa1d   :  { %v1407_v60 = vpop.xlane.xlu2 %1406 }
 0xa1e   :  { %v1438_v10 = vmul.f32 1.442695, %v1428_v55  ;;  %v1427_v23 = vsub.f32 %v1395_v33, %v1407_v60 }
 0xa20   :  { %2396 = vpow2.f32 %v1438_v10  ;;  %v1436_v61 = vmul.f32 1.442695, %v1427_v23 }
 0xa22   :  { %2398 = vpow2.f32 %v1436_v61 }
 0xa23   :  { %v1422_v63 = vpop.xlane.xlu1 %1421 }
 0xa24   :  { %v1432_v7 = vsub.f32 %v1400_v37, %v1422_v63 }
 0xa25   :  { %v1416_v18 = vpop.xlane.xlu0 %1415 }
 0xa26   :  { %v3203_v11 = vpop.eup %2396  ;;  %v1446_v17 = vmul.f32 1.442695, %v1432_v7  ;;  %v1430_v20 = vsub.f32 %v1398_v14, %v1416_v18 }
 0xa27   :  { %v1456_v6 = vsel %vm214_vm1, %v3203_v11, 0.0 }
 0xa28   :  { %v3207_v9 = vpop.eup %2398  ;;  %2400 = vpow2.f32 %v1446_v17  ;;  %v1442_v21 = vmul.f32 1.442695, %v1430_v20  ;;  %1457 = vadd.xlane.f32.xlu0 %v1456_v6 }
 0xa29   :  { %v1453_v25 = vsel %vm214_vm1, %v3207_v9, 0.0 }
 0xa2a   :  { %2402 = vpow2.f32 %v1442_v21  ;;  %1454 = vadd.xlane.f32.xlu1 %v1453_v25 }
 0xa2e   :  { %v3211_v29 = vpop.eup %2400 }
 0xa2f   :  { %v1468_v30 = vsel %vm214_vm1, %v3211_v29, 0.0 }
 0xa30   :  { %v3215_v1 = vpop.eup %2402  ;;  %1469 = vadd.xlane.f32.xlu0 %v1468_v30 }
 0xa31   :  { %v1462_v31 = vsel %vm214_vm1, %v3215_v1, 0.0 }
 0xa32   :  { %1463 = vadd.xlane.f32.xlu2 %v1462_v31 }
 0xa43   :  { %2320 = vrot.lane.b32.xlu1 %v2319_v24, %s2655_s26 }
 0xa47   :  { %v1413_v32 = vpop.xlane.xlu0 %1412 }
 0xa48   :  { %v1429_v34 = vsub.f32 %v1397_v43, %v1413_v32 }
 0xa49   :  { %v1419_v46 = vpop.xlane.xlu2 %1418 }
 0xa4a   :  { %v1431_v33 = vsub.f32 %v1399_v48, %v1419_v46  ;;  %v1440_v36 = vmul.f32 1.442695, %v1429_v34 }
 0xa4b   :  { %1805 = vrot.lane.b32.xlu1 %v3144_v5, %s2655_s26 }
 0xa4c   :  { %v1444_v35 = vmul.f32 1.442695, %v1431_v33 }
 0xa4e   :  { %2404 = vpow2.f32 %v1444_v35 }
 0xa4f   :  { %v1425_v37 = vpop.xlane.xlu1 %1424  ;;  %2406 = vpow2.f32 %v1440_v36 }
 0xa50   :  { %v1433_v38 = vsub.f32 %v1401_v54, %v1425_v37 }
 0xa52   :  { %v1448_v14 = vmul.f32 1.442695, %v1433_v38 }
 0xa54   :  { %v3224_v39 = vpop.eup %2404  ;;  %2408 = vpow2.f32 %v1448_v14 }
 0xa55   :  { %v1465_v4 = vsel %vm214_vm1, %v3224_v39, 0.0  ;;  %v3228_v3 = vpop.eup %2406 }
 0xa56   :  { %1466 = vadd.xlane.f32.xlu2 %v1465_v4  ;;  %v1459_v43 = vsel %vm214_vm1, %v3228_v3, 0.0 }
 0xa57   :  { %v1452_v47 = vpop.xlane.xlu1 %1451 }
 0xa58   :  { %2410 = vrcp.f32 %v1452_v47  ;;  %vm1479_vm12 = vweird.f32 %v1452_v47  ;;  %v1485_v23 = vand.u32 2147483648, %v1452_v47  ;;  %v1483_v63 = vand.u32 2147483647, %v1452_v47 }
 0xa5a   :  { %v3230_v40 = vpop.eup %2408  ;;  %v3232_v41 = vpop.permute.xlu0 %2325  ;;  %v1486_v6 = vor.u32 1.1754944e-38, %v1485_v23  ;;  %vm1484_vm3 = vcmp.eq.f32.partialorder %v1483_v63, 8.507059e+37 }
 0xa5b   :  { %v2327_v5 = vunpack.i.l.bf16 %v3232_v41  ;;  %v1471_v42 = vsel %vm214_vm1, %v3230_v40, 0.0  ;;  %v2328_v38 = vunpack.i.h.bf16 %v3232_v41 }
 0xa5c   :  { %1472 = vadd.xlane.f32.xlu0 %v1471_v42 }
 0xa5d   :  { %1725 = vmatpush.msrb.mxu3 %v2327_v5 }
 0xa5e   :  { %1460 = vadd.xlane.f32.xlu2 %v1459_v43  ;;  %v2411_v50 = vpop.eup %2410 }
 0xa5f   :  { %v1475_v51 = vmul.f32 %v2411_v50, %v1452_v47  ;;  %vm1480_vm10 = vweird.f32 %v2411_v50 }
 0xa60   :  { %vm1481_vm13 = vmor %vm1479_vm12, %vm1480_vm10 }
 0xa61   :  { %v1476_v56 = vsub.f32 1.0, %v1475_v51 }
 0xa63   :  { %v1477_v58 = vmul.f32 %v2411_v50, %v1476_v56 }
 0xa65   :  { %v1478_v0 = vadd.f32 %v2411_v50, %v1477_v58 }
 0xa67   :  { %v1482_v18 = vsel %vm1481_vm13, %v2411_v50, %v1478_v0 }
 0xa68   :  { %v1487_v25 = vsel %vm1484_vm3, %v1486_v6, %v1482_v18 }
 0xa69   :  { %v3247_v36 = vmul.f32 %v3196_v57, %v1487_v25 }
 0xa70   :  { %1755 = vrot.lane.b32.xlu0 %v3161_v13, %s2655_s26 }
 0xa76   :  { %2330 = vrot.lane.b32.xlu2 %v2329_v44, %s2655_s26 }
 0xa9b   :  { %v1458_v48 = vpop.xlane.xlu0 %1457 }
 0xa9c   :  { %2412 = vrcp.f32 %v1458_v48  ;;  %v1513_v61 = vand.u32 2147483648, %v1458_v48  ;;  %vm1507_vm14 = vweird.f32 %v1458_v48  ;;  %v1511_v7 = vand.u32 2147483647, %v1458_v48 }
 0xa9d   :  { %v3244_v60 = vpop.xlane.xlu1 %1454 }
 0xa9e   :  { %v1514_v21 = vor.u32 1.1754944e-38, %v1513_v61  ;;  %vm1512_vm4 = vcmp.eq.f32.partialorder %v1511_v7, 8.507059e+37  ;;  %vm1493_vm13 = vweird.f32 %v3244_v60 }
 0xaa2   :  { %v2413_v49 = vpop.eup %2412 }
 0xaa3   :  { %v1503_v52 = vmul.f32 %v2413_v49, %v1458_v48  ;;  %v1470_v54 = vpop.xlane.xlu0 %1469  ;;  %vm1508_vm11 = vweird.f32 %v2413_v49 }
 0xaa4   :  { %2414 = vrcp.f32 %v1470_v54  ;;  %vm1509_vm2 = vmor %vm1507_vm14, %vm1508_vm11  ;;  %v1569_v32 = vand.u32 2147483648, %v1470_v54  ;;  %vm1563_vm8 = vweird.f32 %v1470_v54  ;;  %v1567_v35 = vand.u32 2147483647, %v1470_v54 }
 0xaa5   :  { %v1504_v22 = vsub.f32 1.0, %v1503_v52  ;;  %v1464_v46 = vpop.xlane.xlu2 %1463  ;;  %2416 = vrcp.f32 %v3244_v60 }
 0xaa6   :  { %2418 = vrcp.f32 %v1464_v46  ;;  %v1570_v57 = vor.u32 1.1754944e-38, %v1569_v32  ;;  %vm1568_vm10 = vcmp.eq.f32.partialorder %v1567_v35, 8.507059e+37  ;;  %v1539_v0 = vand.u32 2147483647, %v1464_v46 }
 0xaa7   :  { %v1505_v59 = vmul.f32 %v2413_v49, %v1504_v22 }
 0xaa9   :  { %v1506_v8 = vadd.f32 %v2413_v49, %v1505_v59 }
 0xaaa   :  { %v2415_v13 = vpop.eup %2414 }
 0xaab   :  { %v1559_v55 = vmul.f32 %v2415_v13, %v1470_v54  ;;  %v1510_v17 = vsel %vm1509_vm2, %v2413_v49, %v1506_v8  ;;  %vm1564_vm5 = vweird.f32 %v2415_v13  ;;  %v2417_v5 = vpop.eup %2416  ;;  %vm1535_vm2 = vweird.f32 %v1464_v46 }
 0xaac   :  { %v1515_v30 = vsel %vm1512_vm4, %v1514_v21, %v1510_v17  ;;  %vm1565_vm9 = vmor %vm1563_vm8, %vm1564_vm5  ;;  %v2419_v41 = vpop.eup %2418  ;;  %v1489_v43 = vmul.f32 %v2417_v5, %v3244_v60  ;;  %vm1494_vm11 = vweird.f32 %v2417_v5  ;;  %vm1540_vm5 = vcmp.eq.f32.partialorder %v1539_v0, 8.507059e+37 }
 0xaad   :  { %v1560_v10 = vsub.f32 1.0, %v1559_v55  ;;  %v3250_v37 = vmul.f32 %v3203_v11, %v1515_v30  ;;  %v1531_v44 = vmul.f32 %v2419_v41, %v1464_v46  ;;  %vm1536_vm12 = vweird.f32 %v2419_v41  ;;  %vm1495_vm14 = vmor %vm1493_vm13, %vm1494_vm11 }
 0xaae   :  { %v1490_v47 = vsub.f32 1.0, %v1489_v43  ;;  %v1541_v55 = vand.u32 2147483648, %v1464_v46  ;;  %vm1537_vm3 = vmor %vm1535_vm2, %vm1536_vm12 }
 0xaaf   :  { %v1561_v20 = vmul.f32 %v2415_v13, %v1560_v10  ;;  %v1532_v48 = vsub.f32 1.0, %v1531_v44 }
 0xab0   :  { %v1491_v51 = vmul.f32 %v2417_v5, %v1490_v47  ;;  %v1542_v18 = vor.u32 1.1754944e-38, %v1541_v55 }
 0xab1   :  { %v1562_v31 = vadd.f32 %v2415_v13, %v1561_v20  ;;  %v1533_v49 = vmul.f32 %v2419_v41, %v1532_v48 }
 0xab2   :  { %v1492_v56 = vadd.f32 %v2417_v5, %v1491_v51 }
 0xab3   :  { %v1566_v14 = vsel %vm1565_vm9, %v2415_v13, %v1562_v31  ;;  %v1534_v22 = vadd.f32 %v2419_v41, %v1533_v49  ;;  %v1497_v13 = vand.u32 2147483647, %v3244_v60 }
 0xab4   :  { %v1571_v11 = vsel %vm1568_vm10, %v1570_v57, %v1566_v14  ;;  %v1496_v10 = vsel %vm1495_vm14, %v2417_v5, %v1492_v56 }
 0xab5   :  { %v2321_v24 = vpop.permute.xlu1 %2320  ;;  %v3259_v42 = vmul.f32 %v3211_v29, %v1571_v11  ;;  %v1499_v29 = vand.u32 2147483648, %v3244_v60  ;;  %v1538_v61 = vsel %vm1537_vm3, %v2419_v41, %v1534_v22  ;;  %vm1498_vm4 = vcmp.eq.f32.partialorder %v1497_v13, 8.507059e+37 }
 0xab6   :  { %v2323_v33 = vunpack.i.h.bf16 %v2321_v24  ;;  %v2322_v34 = vunpack.i.l.bf16 %v2321_v24  ;;  %v1543_v60 = vsel %vm1540_vm5, %v1542_v18, %v1538_v61  ;;  %v2258_v61 = vld [vmem:[%s3464_s3 + $0x30] sm:$0xff] }
 0xab7   :  { %v1500_v23 = vor.u32 1.1754944e-38, %v1499_v29 }
 0xab8   :  { %1650 = vmatpush.msra.mxu0 %v2323_v33  ;;  %1700 = vmatpush.msrb.mxu2 %v2322_v34 }
 0xab9   :  { %2248 = vmatmul.msk.f32.vlgmr.msra.gmra.mxu0 %vm214_vm1, %v3247_v36  ;;  %2250 = vmatmul.msk.f32.vlgmr.msrb.gmra.mxu2 %vm214_vm1, %v3250_v37  ;;  %v1501_v17 = vsel %vm1498_vm4, %v1500_v23, %v1496_v10  ;;  %v2259_v23 = vld [vmem:[%s3464_s3 + $0x38] sm:$0xff] }
 0xaba   :  { %1800 = vmatpush.msra.mxu2 %v2328_v38  ;;  %v3272_v33 = vmul.f32 %v3207_v9, %v1501_v17  ;;  %v3275_v38 = vmul.f32 %v3215_v1, %v1543_v60 }
 0xabd   :  { %v1806_v4 = vpop.permute.xlu1 %1805 }
 0xabe   :  { %1825 = vmatpush.msra.mxu3 %v1806_v4 }
 0xac1   :  { %2254 = vmatmul.msk.f32.vlgmr.msra.gmra.mxu2 %vm214_vm1, %v3259_v42 }
 0xac9   :  { %v1467_v50 = vpop.xlane.xlu2 %1466 }
 0xaca   :  { %2420 = vrcp.f32 %v1467_v50  ;;  %v1555_v24 = vand.u32 2147483648, %v1467_v50  ;;  %vm1549_vm9 = vweird.f32 %v1467_v50  ;;  %v1553_v34 = vand.u32 2147483647, %v1467_v50 }
 0xacc   :  { %v1556_v1 = vor.u32 1.1754944e-38, %v1555_v24  ;;  %vm1554_vm12 = vcmp.eq.f32.partialorder %v1553_v34, 8.507059e+37  ;;  %v2343_v34 = vld [vmem:[#allocation5 + $0x1] ss:$0 sm:$0xff] }
 0xacf   :  { %v3264_v52 = vpop.xlane.xlu0 %1472 }
 0xad0   :  { %v2421_v54 = vpop.eup %2420  ;;  %2422 = vrcp.f32 %v3264_v52  ;;  %vm1577_vm4 = vweird.f32 %v3264_v52 }
 0xad1   :  { %v1545_v58 = vmul.f32 %v2421_v54, %v1467_v50  ;;  %v1461_v59 = vpop.xlane.xlu2 %1460  ;;  %vm1550_vm8 = vweird.f32 %v2421_v54  ;;  %v1583_v50 = vand.u32 2147483648, %v3264_v52 }
 0xad2   :  { %2424 = vrcp.f32 %v1461_v59  ;;  %vm3277_vm10 = vmor %vm1549_vm9, %vm1550_vm8  ;;  %v1525_v57 = vand.u32 2147483647, %v1461_v59  ;;  %v1527_v11 = vand.u32 2147483648, %v1461_v59  ;;  %vm1521_vm13 = vweird.f32 %v1461_v59 }
 0xad3   :  { %v1546_v8 = vsub.f32 1.0, %v1545_v58  ;;  %v1584_v58 = vor.u32 1.1754944e-38, %v1583_v50 }
 0xad4   :  { %v1528_v44 = vor.u32 1.1754944e-38, %v1527_v11  ;;  %vm1526_vm3 = vcmp.eq.f32.partialorder %v1525_v57, 8.507059e+37 }
 0xad5   :  { %v1547_v63 = vmul.f32 %v2421_v54, %v1546_v8 }
 0xad6   :  { %v2423_v7 = vpop.eup %2422 }
 0xad7   :  { %v1573_v20 = vmul.f32 %v2423_v7, %v3264_v52  ;;  %v1548_v21 = vadd.f32 %v2421_v54, %v1547_v63  ;;  %vm1578_vm2 = vweird.f32 %v2423_v7  ;;  %v2257_v63 = vld [vmem:[%s3464_s3 + $0x28] sm:$0xff] }
 0xad8   :  { %v2425_v6 = vpop.eup %2424  ;;  %vm1579_vm5 = vmor %vm1577_vm4, %vm1578_vm2 }
 0xad9   :  { %v1574_v25 = vsub.f32 1.0, %v1573_v20  ;;  %v1517_v30 = vmul.f32 %v2425_v6, %v1461_v59  ;;  %v2331_v31 = vpop.permute.xlu2 %2330  ;;  %v1552_v4 = vsel %vm3277_vm10, %v2421_v54, %v1548_v21  ;;  %vm1522_vm11 = vweird.f32 %v2425_v6 }
 0xada   :  { %v2333_v32 = vunpack.i.h.bf16 %v2331_v31  ;;  %v2332_v46 = vunpack.i.l.bf16 %v2331_v31  ;;  %v1557_v43 = vsel %vm1554_vm12, %v1556_v1, %v1552_v4  ;;  %vm1523_vm14 = vmor %vm1521_vm13, %vm1522_vm11  ;;  %v1581_v54 = vand.u32 2147483647, %v3264_v52 }
 0xadb   :  { %v1518_v35 = vsub.f32 1.0, %v1517_v30  ;;  %v1575_v5 = vmul.f32 %v2423_v7, %v1574_v25  ;;  %v3294_v29 = vmul.f32 %v3224_v39, %v1557_v43 }
 0xadc   :  { %1675 = vmatpush.msrb.mxu1 %v2332_v46  ;;  %1750 = vmatpush.msrb.mxu0 %v2333_v32  ;;  %vm1582_vm8 = vcmp.eq.f32.partialorder %v1581_v54, 8.507059e+37 }
 0xadd   :  { %v1519_v9 = vmul.f32 %v2425_v6, %v1518_v35  ;;  %2249 = vmatmul.msk.f32.vlgmr.msrb.gmra.mxu1 %vm214_vm1, %v3272_v33  ;;  %2252 = vmatmul.msk.f32.vlgmr.msrb.gmra.mxu0 %vm214_vm1, %v3275_v38  ;;  %v1576_v47 = vadd.f32 %v2423_v7, %v1575_v5 }
 0xade   :  { %1888 = vmatpush.msra.mxu0 %v2259_v23  ;;  %v2274_v23 = vld [vmem:[%s3470_s9 + $0x68] sm:$0xff] }
 0xadf   :  { %v1520_v41 = vadd.f32 %v2425_v6, %v1519_v9  ;;  %v1580_v22 = vsel %vm1579_vm5, %v2423_v7, %v1576_v47  ;;  %v2256_v7 = vld [vmem:[%s3464_s3 + $0x20] sm:$0xff] }
 0xae0   :  { %v1585_v59 = vsel %vm1582_vm8, %v1584_v58, %v1580_v22  ;;  %1889 = vmatpush.msra.mxu0 %v2258_v61  ;;  %v2265_v22 = vld [vmem:[%s3468_s7 + $0x30] sm:$0xff]  ;;  %v2264_v58 = vld [vmem:[%s3468_s7 + $0x28] sm:$0xff] }
 0xae1   :  { %v1524_v48 = vsel %vm1523_vm14, %v2425_v6, %v1520_v41  ;;  %v3301_v52 = vmul.f32 %v3230_v40, %v1585_v59 }
 0xae2   :  { %v1529_v51 = vsel %vm1526_vm3, %v1528_v44, %v1524_v48  ;;  %v1756_v49 = vpop.permute.xlu0 %1755  ;;  %1890 = vmatpush.msra.mxu0 %v2257_v63 }
 0xae3   :  { %1775 = vmatpush.msra.mxu1 %v1756_v49  ;;  %v3291_v56 = vmul.f32 %v3228_v3, %v1529_v51 }
 0xae4   :  { %1891 = vmatpush.msra.mxu0 %v2256_v7 }
 0xae5   :  { %2251 = vmatmul.msk.f32.vlgmr.msrb.gmra.mxu3 %vm214_vm1, %v3291_v56  ;;  %2253 = vmatmul.msk.f32.vlgmr.msra.gmra.mxu1 %vm214_vm1, %v3294_v29 }
 0xaed   :  { %2255 = vmatmul.msk.f32.vlgmr.msra.gmra.mxu3 %vm214_vm1, %v3301_v52 }
 0xb36   :  { %v1652_v13 = vpop.f32.mrf.mxu0 }
 0xb3c   :  { %v1702_v3 = vpop.f32.mrf.mxu2 }
 0xb3d   :  { %1832 = vrot.lane.b32.xlu1 %v1702_v3, %s2647_s13  ;;  %v2263_v3 = vld [vmem:[%s3468_s7 + $0x20] sm:$0xff] }
 0xb44   :  { %v1802_v39 = vpop.f32.mrf.mxu2 }
 0xb45   :  { %1848 = vrot.lane.b32.xlu2 %v1802_v39, %s2656_s23 }
 0xb5a   :  { %v1677_v55 = vpop.f32.mrf.mxu1  ;;  %v1752_v0 = vpop.f32.mrf.mxu0 }
 0xb5b   :  { %1840 = vrot.lane.b32.xlu0 %v1752_v0, %s2641_s29 }
 0xb62   :  { %v1777_v8 = vpop.f32.mrf.mxu1 }
 0xb63   :  { %1842 = vrot.lane.b32.xlu0 %v1777_v8, %s2641_s29  ;;  %v2276_v8 = vld [vmem:[%s3470_s9 + $0x78] sm:$0xff] }
 0xb64   :  { %2028 = vmatpush.msrb.mxu2 %v2276_v8 }
 0xb68   :  { %v1727_v10 = vpop.f32.mrf.mxu3 }
 0xb69   :  { %1834 = vrot.lane.b32.xlu1 %v1727_v10, %s2647_s13  ;;  %v2275_v10 = vld [vmem:[%s3470_s9 + $0x70] sm:$0xff] }
 0xb6a   :  { %2029 = vmatpush.msrb.mxu2 %v2275_v10 }
 0xb6c   :  { %2030 = vmatpush.msrb.mxu2 %v2274_v23 }
 0xb70   :  { %v1827_v40 = vpop.f32.mrf.mxu3 }
 0xb71   :  { %1850 = vrot.lane.b32.xlu2 %v1827_v40, %s2656_s23 }
 0xb9f   :  { %v1849_v6 = vpop.permute.xlu2 %1848 }
 0xbaf   :  { %v1833_v18 = vpop.permute.xlu1 %1832 }
 0xbb0   :  { %v1854_v17 = vsel %vm214_vm1, %v1652_v13, %v1833_v18  ;;  %v2273_v18 = vld [vmem:[%s3470_s9 + $0x60] sm:$0xff] }
 0xbb1   :  { %2031 = vmatpush.msrb.mxu2 %v2273_v18 }
 0xbcb   :  { %v1851_v24 = vpop.permute.xlu2 %1850 }
 0xbcd   :  { %v1841_v20 = vpop.permute.xlu0 %1840 }
 0xbce   :  { %v1856_v60 = vsel %vm650_vm6, %v1854_v17, %v1841_v20 }
 0xbcf   :  { %v1858_v21 = vsel %vm652_vm7, %v1856_v60, %v1849_v6  ;;  %v2272_v6 = vld [vmem:[%s3470_s9 + $0x58] sm:$0xff] }
 0xbd0   :  { %2260 = vmatmul.msk.f32.vlgmr.msra.gmra.mxu0 %vm168_vm0, %v1858_v21  ;;  %v2344_v21 = vld [vmem:[%s3466_s5 + $0x1] ss:$0 sm:$0xff]  ;;  %2032 = vmatpush.msrb.mxu2 %v2272_v6 }
 0xbd5   :  { %v1843_v30 = vpop.permute.xlu0 %1842 }
 0xbdb   :  { %v1835_v25 = vpop.permute.xlu1 %1834 }
 0xbdc   :  { %v1855_v31 = vsel %vm214_vm1, %v1677_v55, %v1835_v25 }
 0xbdd   :  { %v1857_v32 = vsel %vm650_vm6, %v1855_v31, %v1843_v30  ;;  %v2345_v31 = vld [vmem:[#allocation7 + $0x1] ss:$0 sm:$0xff] }
 0xbde   :  { %v1859_v46 = vsel %vm652_vm7, %v1857_v32, %v1851_v24 }
 0xbdf   :  { %2261 = vmatmul.msk.f32.gmra.mxu0 %vm168_vm0, %v1859_v46 }
 0xc4d   :  { %v1893_v35 = vpop.f32.mrf.mxu0 }
 0xc4e   :  { %v1894_v14 = vadd.f32 %v2343_v34, %v1893_v35 }
 0xc50   :  { %v1899_v57 = vadd.f32 %v1894_v14, %v3109_v53 }
 0xc52   :  { %v1905_v11 = vsel %vm168_vm0, %v1899_v57, 0.0 }
 0xc53   :  { %1906 = vadd.xlane.f32.xlu1 %v1905_v11 }
 0xc5c   :  { %v1896_v4 = vpop.f32.mrf.mxu0 }
 0xc5d   :  { %v1897_v5 = vadd.f32 %v2343_v34, %v1896_v4 }
 0xc5f   :  { %v1900_v9 = vadd.f32 %v1897_v5, %v3113_v12  ;;  %v2266_v12 = vld [vmem:[%s3468_s7 + $0x38] sm:$0xff] }
 0xc60   :  { %1987 = vmatpush.msrb.mxu1 %v2266_v12  ;;  %v2347_v12 = vld [vmem:[#allocation10 + $0x1] ss:$0 sm:$0xff] }
 0xc61   :  { %v1908_v1 = vsel %vm168_vm0, %v1900_v9, 0.0 }
 0xc62   :  { %1909 = vadd.xlane.f32.xlu0 %v1908_v1  ;;  %1988 = vmatpush.msrb.mxu1 %v2265_v22 }
 0xc64   :  { %1989 = vmatpush.msrb.mxu1 %v2264_v58 }
 0xc66   :  { %1990 = vmatpush.msrb.mxu1 %v2263_v3 }
 0xcc6   :  { %v1907_v41 = vpop.xlane.xlu1 %1906 }
 0xcc7   :  { %v1911_v43 = vmul.f32 %v1907_v41, %v3032_v62  ;;  %v2271_v41 = vld [vmem:[%s3470_s9 + $0x50] sm:$0xff] }
 0xcc8   :  { %2033 = vmatpush.msrb.mxu2 %v2271_v41 }
 0xcc9   :  { %v1913_v44 = vsub.f32 %v1899_v57, %v1911_v43  ;;  %v2270_v43 = vld [vmem:[%s3470_s9 + $0x48] sm:$0xff] }
 0xcca   :  { %2034 = vmatpush.msrb.mxu2 %v2270_v43 }
 0xccb   :  { %v1915_v47 = vmul.f32 %v1913_v44, %v1913_v44 }
 0xccd   :  { %v1917_v48 = vsel %vm168_vm0, %v1915_v47, 0.0  ;;  %v2346_v47 = vld [vmem:[#allocation8 + $0x1] ss:$0 sm:$0xff] }
 0xcce   :  { %1918 = vadd.xlane.f32.xlu2 %v1917_v48 }
 0xcd5   :  { %v1910_v50 = vpop.xlane.xlu0 %1909 }
 0xcd6   :  { %v1912_v53 = vmul.f32 %v1910_v50, %v3032_v62 }
 0xcd8   :  { %v1914_v51 = vsub.f32 %v1900_v9, %v1912_v53 }
 0xcda   :  { %v1916_v49 = vmul.f32 %v1914_v51, %v1914_v51 }
 0xcdc   :  { %v1920_v54 = vsel %vm168_vm0, %v1916_v49, 0.0 }
 0xcdd   :  { %1921 = vadd.xlane.f32.xlu1 %v1920_v54 }
 0xd41   :  { %v1919_v59 = vpop.xlane.xlu2 %1918 }
 0xd42   :  { %v1923_v39 = vmul.f32 %v1919_v59, %v3032_v62 }
 0xd44   :  { %v1925_v13 = vadd.f32 1e-05, %v1923_v39 }
 0xd46   :  { %2426 = vrsqrt.f32 %v1925_v13  ;;  %vm1933_vm10 = vweird.f32 %v1925_v13 }
 0xd4c   :  { %v2427_v55 = vpop.eup %2426 }
 0xd4d   :  { %v1928_v0 = vmul.f32 %v2427_v55, %v1925_v13  ;;  %vm1934_vm9 = vweird.f32 %v2427_v55 }
 0xd4e   :  { %vm1935_vm11 = vmor %vm1933_vm10, %vm1934_vm9  ;;  %vm655_vm10 = vcmask 326656  }
 0xd4f   :  { %v1929_v40 = vmul.f32 %v2427_v55, %v1928_v0 }
 0xd50   :  { %v1922_v61 = vpop.xlane.xlu1 %1921 }
 0xd51   :  { %v1930_v63 = vmul.f32 0.5, %v1929_v40  ;;  %v1924_v7 = vmul.f32 %v1922_v61, %v3032_v62 }
 0xd53   :  { %v1931_v17 = vsub.f32 1.5, %v1930_v63  ;;  %v1926_v20 = vadd.f32 1e-05, %v1924_v7 }
 0xd55   :  { %v1932_v60 = vmul.f32 %v2427_v55, %v1931_v17  ;;  %2428 = vrsqrt.f32 %v1926_v20  ;;  %vm1943_vm13 = vweird.f32 %v1926_v20 }
 0xd57   :  { %v1936_v25 = vsel %vm1935_vm11, %v2427_v55, %v1932_v60  ;;  %vm657_vm11 = vcmask 392192  }
 0xd58   :  { %v1947_v30 = vmul.f32 %v1936_v25, %v1913_v44  ;;  %v2269_v44 = vld [vmem:[%s3470_s9 + $0x40] sm:$0xff]  ;;  %s2658_s9 = smov 56  }
 0xd59   :  { %2035 = vmatpush.msrb.mxu2 %v2269_v44 }
 0xd5a   :  { %v1952_v24 = vmul.f32 %v2344_v21, %v1947_v30 }
 0xd5b   :  { %v2429_v32 = vpop.eup %2428 }
 0xd5c   :  { %v1938_v46 = vmul.f32 %v2429_v32, %v1926_v20  ;;  %v1957_v34 = vadd.f32 %v2345_v31, %v1952_v24  ;;  %vm1944_vm12 = vweird.f32 %v2429_v32 }
 0xd5d   :  { %vm1945_vm14 = vmor %vm1943_vm13, %vm1944_vm12  ;;  %vm659_vm12 = vcmask 457728  }
 0xd5e   :  { %v1939_v35 = vmul.f32 %v2429_v32, %v1938_v46  ;;  %2267 = vmatmul.msk.f32.vlgmr.msrb.gmra.mxu1 %vm168_vm0, %v1957_v34 }
 0xd60   :  { %v1940_v14 = vmul.f32 0.5, %v1939_v35 }
 0xd62   :  { %v1941_v57 = vsub.f32 1.5, %v1940_v14 }
 0xd64   :  { %v1942_v11 = vmul.f32 %v2429_v32, %v1941_v57 }
 0xd66   :  { %v1946_v4 = vsel %vm1945_vm14, %v2429_v32, %v1942_v11 }
 0xd67   :  { %v1948_v5 = vmul.f32 %v1946_v4, %v1914_v51 }
 0xd69   :  { %v1953_v9 = vmul.f32 %v2344_v21, %v1948_v5 }
 0xd6b   :  { %v1958_v1 = vadd.f32 %v2345_v31, %v1953_v9 }
 0xd6d   :  { %2268 = vmatmul.msk.f32.gmra.mxu1 %vm168_vm0, %v1958_v1 }
 0xddb   :  { %v1992_v48 = vpop.f32.mrf.mxu1 }
 0xddc   :  { %v1993_v50 = vadd.f32 %v2346_v47, %v1992_v48 }
 0xdde   :  { %v1998_v53 = vmax.f32 %v1993_v50, 0.0 }
 0xde0   :  { %2277 = vmatmul.msk.f32.vlgmr.msrb.gmra.mxu2 %vm1045_vm15, %v1998_v53 }
 0xdea   :  { %v1995_v51 = vpop.f32.mrf.mxu1 }
 0xdeb   :  { %v1996_v49 = vadd.f32 %v2346_v47, %v1995_v51 }
 0xded   :  { %v1999_v54 = vmax.f32 %v1996_v49, 0.0 }
 0xdef   :  { %2278 = vmatmul.msk.f32.gmra.mxu2 %vm1045_vm15, %v1999_v54 }
 0xe63   :  { %v2037_v22 = vpop.f32.mrf.mxu2 }
 0xe64   :  { %v2038_v58 = vadd.f32 %v2347_v12, %v2037_v22 }
 0xe66   :  { %v2043_v59 = vadd.f32 %v2038_v58, %v1957_v34  ;;  %v2349_v34 = vld [vmem:[%s3473_s12 + $0x1] ss:$0 sm:$0xff] }
 0xe68   :  { %v2049_v3 = vsel %vm168_vm0, %v2043_v59, 0.0 }
 0xe69   :  { %2050 = vadd.xlane.f32.xlu0 %v2049_v3 }
 0xe72   :  { %v2040_v39 = vpop.f32.mrf.mxu2 }
 0xe73   :  { %v2041_v13 = vadd.f32 %v2347_v12, %v2040_v39 }
 0xe75   :  { %v2044_v55 = vadd.f32 %v2041_v13, %v1958_v1 }
 0xe77   :  { %v2052_v0 = vsel %vm168_vm0, %v2044_v55, 0.0 }
 0xe78   :  { %2053 = vadd.xlane.f32.xlu2 %v2052_v0 }
 0xe90   :  { %1599 = vrot.lane.b32.xlu2 %v3250_v37, %s2641_s29 }
 0xedc   :  { %v2051_v8 = vpop.xlane.xlu0 %2050 }
 0xedd   :  { %v2055_v10 = vmul.f32 %v2051_v8, %v3032_v62 }
 0xedf   :  { %v2057_v40 = vsub.f32 %v2043_v59, %v2055_v10 }
 0xee1   :  { %v2059_v23 = vmul.f32 %v2057_v40, %v2057_v40 }
 0xee3   :  { %v2061_v61 = vsel %vm168_vm0, %v2059_v23, 0.0 }
 0xee4   :  { %2062 = vadd.xlane.f32.xlu1 %v2061_v61 }
 0xeeb   :  { %v2054_v63 = vpop.xlane.xlu2 %2053 }
 0xeec   :  { %v2056_v7 = vmul.f32 %v2054_v63, %v3032_v62 }
 0xeee   :  { %v2058_v18 = vsub.f32 %v2044_v55, %v2056_v7 }
 0xef0   :  { %v2060_v17 = vmul.f32 %v2058_v18, %v2058_v18 }
 0xef2   :  { %v2064_v20 = vsel %vm168_vm0, %v2060_v17, 0.0 }
 0xef3   :  { %2065 = vadd.xlane.f32.xlu0 %v2064_v20  ;;  %v1600_v51 = vpop.permute.xlu2 %1599 }
 0xefd   :  { %1603 = vrot.lane.b32.xlu1 %v3291_v56, %s2656_s23 }
 0xf05   :  { %1619 = vrot.lane.b32.xlu1 %v3301_v52, %s2658_s9 }
 0xf07   :  { %1595 = vrot.lane.b32.xlu0 %v3272_v33, %s2647_s13 }
 0xf0f   :  { %1607 = vrot.lane.b32.xlu0 %v3275_v38, %s2659_s30 }
 0xf17   :  { %1615 = vrot.lane.b32.xlu0 %v3259_v42, %s2660_s1  ;;  %v2348_v42 = vld [vmem:[%s3472_s11 + $0x1] ss:$0 sm:$0xff]  ;;  %s2661_s11 = smov 40  }
 0xf57   :  { %v2063_v37 = vpop.xlane.xlu1 %2062 }
 0xf58   :  { %v2067_v6 = vmul.f32 %v2063_v37, %v3032_v62 }
 0xf5a   :  { %v2069_v60 = vadd.f32 1e-05, %v2067_v6 }
 0xf5c   :  { %2430 = vrsqrt.f32 %v2069_v60  ;;  %vm2077_vm3 = vweird.f32 %v2069_v60 }
 0xf62   :  { %v2431_v56 = vpop.eup %2430 }
 0xf63   :  { %v2072_v21 = vmul.f32 %v2431_v56, %v2069_v60  ;;  %vm2078_vm2 = vweird.f32 %v2431_v56 }
 0xf64   :  { %vm2079_vm4 = vmor %vm2077_vm3, %vm2078_vm2 }
 0xf65   :  { %v2073_v25 = vmul.f32 %v2431_v56, %v2072_v21 }
 0xf66   :  { %v2066_v52 = vpop.xlane.xlu0 %2065 }
 0xf67   :  { %v2074_v30 = vmul.f32 0.5, %v2073_v25  ;;  %v2068_v33 = vmul.f32 %v2066_v52, %v3032_v62 }
 0xf69   :  { %v2075_v31 = vsub.f32 1.5, %v2074_v30  ;;  %v2070_v24 = vadd.f32 1e-05, %v2068_v33  ;;  %v2350_v33 = vld [vmem:[#allocation11] ss:$0 sm:$0xff] }
 0xf6b   :  { %v2076_v38 = vmul.f32 %v2431_v56, %v2075_v31  ;;  %2432 = vrsqrt.f32 %v2070_v24  ;;  %vm2087_vm8 = vweird.f32 %v2070_v24 }
 0xf6d   :  { %v2080_v32 = vsel %vm2079_vm4, %v2431_v56, %v2076_v38  ;;  %v2351_v38 = vld [vmem:[#allocation13] ss:$0 sm:$0xff] }
 0xf6e   :  { %v2091_v46 = vmul.f32 %v2080_v32, %v2057_v40 }
 0xf6f   :  { %v1604_v49 = vpop.permute.xlu1 %1603 }
 0xf70   :  { %v2096_v35 = vmul.f32 %v2348_v42, %v2091_v46 }
 0xf71   :  { %v2433_v14 = vpop.eup %2432 }
 0xf72   :  { %v2082_v57 = vmul.f32 %v2433_v14, %v2070_v24  ;;  %v2101_v11 = vadd.f32 %v2349_v34, %v2096_v35  ;;  %vm2088_vm5 = vweird.f32 %v2433_v14 }
 0xf73   :  { %vm2089_vm9 = vmor %vm2087_vm8, %vm2088_vm5 }
 0xf74   :  { %v2083_v4 = vmul.f32 %v2433_v14, %v2082_v57  ;;  %v2105_v5 = vsel %vm168_vm0, %v2101_v11, 0.0 }
 0xf75   :  { %2106 = vadd.xlane.f32.xlu2 %v2105_v5 }
 0xf76   :  { %v2084_v9 = vmul.f32 0.5, %v2083_v4 }
 0xf78   :  { %v2085_v1 = vsub.f32 1.5, %v2084_v9 }
 0xf79   :  { %v1596_v53 = vpop.permute.xlu0 %1595 }
 0xf7a   :  { %v2086_v41 = vmul.f32 %v2433_v14, %v2085_v1 }
 0xf7c   :  { %v2090_v43 = vsel %vm2089_vm9, %v2433_v14, %v2086_v41 }
 0xf7d   :  { %v2092_v44 = vmul.f32 %v2090_v43, %v2058_v18 }
 0xf7f   :  { %v2097_v47 = vmul.f32 %v2348_v42, %v2092_v44 }
 0xf81   :  { %v2102_v48 = vadd.f32 %v2349_v34, %v2097_v47  ;;  %v1608_v54 = vpop.permute.xlu0 %1607 }
 0xf83   :  { %v2108_v50 = vsel %vm168_vm0, %v2102_v48, 0.0 }
 0xf84   :  { %2109 = vadd.xlane.f32.xlu1 %v2108_v50 }
 0xf89   :  { %v1616_v39 = vpop.permute.xlu0 %1615 }
 0xf8d   :  { %1611 = vrot.lane.b32.xlu2 %v3294_v29, %s2661_s11  ;;  %v1622_v29 = vsel %vm214_vm1, %v3247_v36, %v1596_v53 }
 0xf9d   :  { %622 = vrot.lane.b32.xlu1 %v2981_v2, %s2647_s13 }
 0xfa5   :  { %626 = vrot.lane.b32.xlu1 %v2961_v15, %s2641_s29  ;;  %v1623_v15 = vsel %vm650_vm6, %v1622_v29, %v1600_v51 }
 0xfad   :  { %630 = vrot.lane.b32.xlu1 %v2941_v19, %s2656_s23  ;;  %v1620_v19 = vpop.permute.xlu1 %1619 }
 0xfb5   :  { %634 = vrot.lane.b32.xlu1 %v2949_v28, %s2659_s30  ;;  %v1624_v28 = vsel %vm652_vm7, %v1623_v15, %v1604_v49 }
 0xfb6   :  { %v1625_v59 = vsel %vm168_vm0, %v1624_v28, %v1608_v54 }
 0xfbd   :  { %638 = vrot.lane.b32.xlu1 %v2993_v26, %s2661_s11 }
 0xfe8   :  { %v2107_v12 = vpop.xlane.xlu2 %2106 }
 0xfe9   :  { %v2111_v2 = vmul.f32 %v2107_v12, %v3032_v62 }
 0xfeb   :  { %v2113_v22 = vsub.f32 %v2101_v11, %v2111_v2 }
 0xfed   :  { %v2115_v58 = vmul.f32 %v2113_v22, %v2113_v22 }
 0xfef   :  { %v2117_v26 = vsel %vm168_vm0, %v2115_v58, 0.0 }
 0xff0   :  { %2118 = vadd.xlane.f32.xlu2 %v2117_v26  ;;  %v1612_v3 = vpop.permute.xlu2 %1611 }
 0xff1   :  { %v1626_v36 = vsel %vm655_vm10, %v1625_v59, %v1612_v3 }
 0xff2   :  { %v1627_v13 = vsel %vm657_vm11, %v1626_v36, %v1616_v39 }
 0xff3   :  { %v1628_v55 = vsel %vm659_vm12, %v1627_v13, %v1620_v19 }
 0xff4   :  { %2162 = vrot.lane.b32.xlu1 %v1628_v55, %s2655_s26  ;;  %s2662_s26 = smov [#allocation14]  }
 0xff5   :  { %s2171_s23 = sshll.u32 %s2662_s26, 4  ;;  %s2172_s23 = int_to_ptr.vmem [resolvable:$true] %s2171_s23 }
 0xff7   :  { %v2110_v0 = vpop.xlane.xlu1 %2109 }
 0xff8   :  { %v2112_v8 = vmul.f32 %v2110_v0, %v3032_v62 }
 0xffa   :  { %v2114_v10 = vsub.f32 %v2102_v48, %v2112_v8 }
 0xffc   :  { %v2116_v40 = vmul.f32 %v2114_v10, %v2114_v10 }
 0xffe   :  { %v2120_v23 = vsel %vm168_vm0, %v2116_v40, 0.0 }
 0xfff   :  { %2121 = vadd.xlane.f32.xlu0 %v2120_v23 }
0x1008   :  { %642 = vrot.lane.b32.xlu2 %v2996_v27, %s2660_s1 }
0x100f   :  { %v623_v61 = vpop.permute.xlu1 %622 }
0x1013   :  { %646 = vrot.lane.b32.xlu0 %v2969_v16, %s2658_s9 }
0x1017   :  { %v627_v63 = vpop.permute.xlu1 %626 }
0x101f   :  { %v631_v20 = vpop.permute.xlu1 %630 }
0x1027   :  { %v635_v52 = vpop.permute.xlu1 %634 }
0x102f   :  { %v639_v46 = vpop.permute.xlu1 %638 }
0x1063   :  { %v2119_v7 = vpop.xlane.xlu2 %2118 }
0x1064   :  { %v2123_v18 = vmul.f32 %v2119_v7, %v3032_v62 }
0x1066   :  { %v2125_v17 = vadd.f32 1e-05, %v2123_v18  ;;  %v2163_v47 = vpop.permute.xlu1 %2162 }
0x1068   :  { %2434 = vrsqrt.f32 %v2125_v17  ;;  %vm2133_vm14 = vweird.f32 %v2125_v17 }
0x106b   :  { %v643_v4 = vpop.permute.xlu2 %642 }
0x106e   :  { %v2435_v37 = vpop.eup %2434 }
0x106f   :  { %v2128_v6 = vmul.f32 %v2435_v37, %v2125_v17  ;;  %vm2134_vm13 = vweird.f32 %v2435_v37 }
0x1070   :  { %vm2135_vm2 = vmor %vm2133_vm14, %vm2134_vm13 }
0x1071   :  { %v2129_v60 = vmul.f32 %v2435_v37, %v2128_v6 }
0x1072   :  { %v2122_v56 = vpop.xlane.xlu0 %2121 }
0x1073   :  { %v2130_v21 = vmul.f32 0.5, %v2129_v60  ;;  %v2124_v25 = vmul.f32 %v2122_v56, %v3032_v62  ;;  %v649_v62 = vsel %vm214_vm1, %v2918_v45, %v623_v61 }
0x1074   :  { %v651_v57 = vsel %vm650_vm6, %v649_v62, %v627_v63 }
0x1075   :  { %v2131_v27 = vsub.f32 1.5, %v2130_v21  ;;  %v2126_v30 = vadd.f32 1e-05, %v2124_v25  ;;  %v653_v11 = vsel %vm652_vm7, %v651_v57, %v631_v20 }
0x1076   :  { %v654_v9 = vsel %vm168_vm0, %v653_v11, %v635_v52 }
0x1077   :  { %v2132_v16 = vmul.f32 %v2435_v37, %v2131_v27  ;;  %2436 = vrsqrt.f32 %v2126_v30  ;;  %v656_v1 = vsel %vm655_vm10, %v654_v9, %v639_v46  ;;  %vm2143_vm1 = vweird.f32 %v2126_v30 }
0x1078   :  { %v658_v43 = vsel %vm657_vm11, %v656_v1, %v643_v4 }
0x1079   :  { %v2136_v31 = vsel %vm2135_vm2, %v2435_v37, %v2132_v16 }
0x107a   :  { %v2147_v24 = vmul.f32 %v2136_v31, %v2113_v22 }
0x107c   :  { %v2152_v42 = vmul.f32 %v2350_v33, %v2147_v24 }
0x107d   :  { %v2437_v32 = vpop.eup %2436 }
0x107e   :  { %v2138_v34 = vmul.f32 %v2437_v32, %v2126_v30  ;;  %v2157_v35 = vadd.f32 %v2351_v38, %v2152_v42  ;;  %vm2144_vm3 = vweird.f32 %v2437_v32 }
0x107f   :  { %vm2145_vm4 = vmor %vm2143_vm1, %vm2144_vm3 }
0x1080   :  { %v2139_v14 = vmul.f32 %v2437_v32, %v2138_v34  ;;  %2159 = vst.msk [vmem:[#allocation14] sm:$0xff] %vm168_vm0, %v2157_v35 }
0x1082   :  { %v2140_v5 = vmul.f32 0.5, %v2139_v14 }
0x1084   :  { %v2141_v41 = vsub.f32 1.5, %v2140_v5 }
0x1085   :  { %v647_v44 = vpop.permute.xlu0 %646 }
0x1086   :  { %v2142_v45 = vmul.f32 %v2437_v32, %v2141_v41  ;;  %v660_v48 = vsel %vm659_vm12, %v658_v43, %v647_v44 }
0x1087   :  { %v2165_v50 = vsel %vm1045_vm15, %v660_v48, %v2163_v47 }
0x1088   :  { %v2146_v53 = vsel %vm2145_vm4, %v2437_v32, %v2142_v45  ;;  %2166 = vst [vmem:[%s3477_s16] sm:$0xff] %v2165_v50 }
0x1089   :  { %v2148_v51 = vmul.f32 %v2146_v53, %v2114_v10 }
0x108b   :  { %v2153_v49 = vmul.f32 %v2350_v33, %v2148_v51 }
0x108d   :  { %v2158_v54 = vadd.f32 %v2351_v38, %v2153_v49 }
0x108f   :  { %2160 = vst.msk [vmem:[#allocation14 + $0x8] sm:$0xff] %vm168_vm0, %v2158_v54 }
0x1090   :  { %2179 = dma.vmem_to_hbm [thread:$0]  %s2172_s23, 256, %s2174_s21, [#allocation4], %s2646_s27, %s2646_s27, %s2647_s13  }
0x1091   :  { %2638 = dma.done.wait [#allocation4], 256  }
0x1092   :  { %2639 = vsyncadd [#allocation4], 4294967040 }
0x1093   :  { %2188 = vsyncpa [#allocation3], 1 }
0x1094   :  { %2189 = vsyncpa [#allocation6], 1 }
0x1095   :  { %2190 = vsyncpa [#allocation9], 1 }
0x1096   :  { %2191 = vsyncpa [#allocation12], 1 }
0x1097   :  { %2192 = vsyncpa [#allocation4], 1 }

</bundles_post_ra>
